<compile_context>
chip_gen: v5e
topology: v5e:2x2
jax: 0.10.0
libtpu: 0.0.40
codegen_flags: <defaults>
</compile_context>

<pallas_src>
import functools

import jax
import jax.numpy as jnp
from jax.experimental import pallas as pl
from jax.experimental.pallas import tpu as pltpu

IN_DIM = 560          # flattened input features (x.view(-1, 560))
HID_DIM = 200         # encoder/decoder hidden width
ENC1_PAD = 512        # 2 * HID_DIM = 400 -> padded to 512 lanes
ENC2_PAD = 128        # 2 * z_dim  =  64 -> padded to 128 lanes
DEC1_PAD = 256        # HID_DIM    = 200 -> padded to 256 lanes
OUT_PAD = 640         # IN_DIM     = 560 -> padded to 640 lanes


def _round_up(x, m):
    return (x + m - 1) // m * m


def _vae_kernel(x_ref, eps_ref,
                w_enc1_ref, b_enc1_ref, w_enc2_ref, b_enc2_ref,
                w_d1_ref, b_d1_ref, w_d2_ref, b_d2_ref,
                recon_ref, lat_ref, *, z_dim):
    """One batch tile of the full VAE forward.

    x_ref      : (TB, 560)       bf16
    eps_ref    : (TB, z)         f32
    w_enc1_ref : (560, 512)      bf16  = [w_mu1 | w_lv1 | 0]
    w_enc2_ref : (512, 128)      bf16  = block-diag(w_mu2, w_lv2), zero padded
    w_d1_ref   : (z, 256)        bf16  = [w_d1 | 0]
    w_d2_ref   : (256, 640)      bf16  = [[w_d2 | 0]; [0]]
    recon_ref  : (TB, 640)       bf16  = [recon(560) | pad]
    lat_ref    : (TB, 128)       f32   = [mu(z) | logvar(z) | pad]
    """
    x = x_ref[...]

    # Fused encoder layer 1: relu(x @ [w_mu1 | w_lv1] + [b_mu1 | b_lv1])
    h = jnp.dot(x, w_enc1_ref[...], preferred_element_type=jnp.float32)
    h = jnp.maximum(h + b_enc1_ref[...], 0.0)                  # (TB, 512) f32

    # Fused encoder layer 2 (block-diagonal): ml = [mu | logvar | 0]
    ml = jnp.dot(h.astype(w_enc2_ref.dtype), w_enc2_ref[...],
                 preferred_element_type=jnp.float32)
    ml = jnp.maximum(ml + b_enc2_ref[...], 0.0)                 # (TB, 128) f32

    # f32 latents out: single lane-dense 128-wide store, no concat temp.
    lat_ref[...] = ml

    mu = ml[:, :z_dim]
    logvar = ml[:, z_dim:2 * z_dim]

    # Reparameterize in f32: z = eps * exp(0.5 * logvar) + mu
    lat = eps_ref[...] * jnp.exp(0.5 * logvar) + mu             # (TB, z) f32

    # Decoder: Linear(z,200) -> ReLU -> Linear(200,560) -> Sigmoid
    h_d = jnp.dot(lat.astype(w_d1_ref.dtype), w_d1_ref[...],
                  preferred_element_type=jnp.float32)
    h_d = jnp.maximum(h_d + b_d1_ref[...], 0.0)                 # (TB, 256) f32
    logits = jnp.dot(h_d.astype(w_d2_ref.dtype), w_d2_ref[...],
                     preferred_element_type=jnp.float32) + b_d2_ref[...]
    # Sigmoid via EUP exp + approx reciprocal (divide-free); clip keeps [0, 1].
    recon = jnp.clip(pl.reciprocal(1.0 + jnp.exp(-logits), approx=True),
                     0.0, 1.0)                                  # (TB, 640) f32

    # Single unmasked, lane-dense bf16 store (pad columns hold sigmoid(0)=0.5,
    # never read by the wrapper).
    recon_ref[...] = recon.astype(recon_ref.dtype)


def _pick_tile(batch):
    """Batch tile: multiple of 8, capped at 512; >=2 grid steps for B>=32
    so v7x can shard the batch across both TensorCores."""
    b8 = _round_up(batch, 8)
    if b8 <= 32:
        return b8
    return min(512, _round_up((b8 + 1) // 2, 8))


@functools.partial(jax.jit, static_argnames=("z_dim",))
def vae_forward(x, eps, fused_params, z_dim):
    """x: (B, 560); eps: (B, z_dim); fused_params: dict from fuse_params().

    Returns (recon[bf16 (B,560)], mu[f32 (B,z)], logvar[f32 (B,z)]).
    """
    B = x.shape[0]
    TB = _pick_tile(B)
    B_pad = _round_up(B, TB)

    x = x.astype(jnp.bfloat16)
    eps = eps.astype(jnp.float32)
    if B_pad != B:
        x = jnp.pad(x, ((0, B_pad - B), (0, 0)))
        eps = jnp.pad(eps, ((0, B_pad - B), (0, 0)))

    fp = fused_params
    weight_args = (fp["w_enc1"], fp["b_enc1"], fp["w_enc2"], fp["b_enc2"],
                   fp["w_d1"], fp["b_d1"], fp["w_d2"], fp["b_d2"])

    in_specs = [
        pl.BlockSpec((TB, IN_DIM), lambda i: (i, 0)),    # x: batch-tiled
        pl.BlockSpec((TB, z_dim), lambda i: (i, 0)),     # eps: batch-tiled
    ] + [
        # Weights: constant block index -> stay VMEM-resident across the grid.
        pl.BlockSpec(w.shape, lambda i: (0, 0)) for w in weight_args
    ]

    out_shape = (
        jax.ShapeDtypeStruct((B_pad, OUT_PAD), jnp.bfloat16),   # recon slab
        jax.ShapeDtypeStruct((B_pad, ENC2_PAD), jnp.float32),   # [mu|logvar]
    )
    out_specs = [
        pl.BlockSpec((TB, OUT_PAD), lambda i: (i, 0)),
        pl.BlockSpec((TB, ENC2_PAD), lambda i: (i, 0)),
    ]

    recon_slab, lat_slab = pl.pallas_call(
        functools.partial(_vae_kernel, z_dim=z_dim),
        out_shape=out_shape,
        grid_spec=pltpu.PrefetchScalarGridSpec(
            num_scalar_prefetch=0,
            grid=(B_pad // TB,),
            in_specs=in_specs,
            out_specs=out_specs,
        ),
        compiler_params=pltpu.CompilerParams(
            dimension_semantics=("parallel",)),
    )(x, eps, *weight_args)

    recon = recon_slab[:B, :IN_DIM]                 # bf16 (perf: half writeback)
    mu = lat_slab[:B, :z_dim]                       # f32
    logvar = lat_slab[:B, z_dim:2 * z_dim]          # f32
    return recon, mu, logvar


def init_params(key, z_dim):
    """PyTorch-layout parameters (weights stored as (in, out), biases (1, out))."""
    ks = jax.random.split(key, 6)

    def linear(k, fan_in, fan_out):
        bound = 1.0 / jnp.sqrt(fan_in)
        kw, kb = jax.random.split(k)
        w = jax.random.uniform(kw, (fan_in, fan_out), jnp.float32, -bound, bound)
        b = jax.random.uniform(kb, (1, fan_out), jnp.float32, -bound, bound)
        return w, b

    p = {}
    p["w_mu1"], p["b_mu1"] = linear(ks[0], IN_DIM, HID_DIM)
    p["w_mu2"], p["b_mu2"] = linear(ks[1], HID_DIM, z_dim)
    p["w_lv1"], p["b_lv1"] = linear(ks[2], IN_DIM, HID_DIM)
    p["w_lv2"], p["b_lv2"] = linear(ks[3], HID_DIM, z_dim)
    p["w_d1"], p["b_d1"] = linear(ks[4], z_dim, HID_DIM)
    p["w_d2"], p["b_d2"] = linear(ks[5], HID_DIM, IN_DIM)
    return p


def fuse_params(p, z_dim):
    """Build fused, lane-padded (multiples of 128), bf16 kernel weights once."""
    assert 2 * z_dim <= ENC2_PAD, "z_dim too large for the 128-lane latent slab"

    # Encoder layer 1: [w_mu1 | w_lv1] padded 400 -> 512 lanes.
    w_enc1 = jnp.zeros((IN_DIM, ENC1_PAD), jnp.float32)
    w_enc1 = w_enc1.at[:, :HID_DIM].set(p["w_mu1"])
    w_enc1 = w_enc1.at[:, HID_DIM:2 * HID_DIM].set(p["w_lv1"])
    b_enc1 = jnp.zeros((1, ENC1_PAD), jnp.float32)
    b_enc1 = b_enc1.at[:, :HID_DIM].set(p["b_mu1"])
    b_enc1 = b_enc1.at[:, HID_DIM:2 * HID_DIM].set(p["b_lv1"])

    # Encoder layer 2: block-diag(w_mu2, w_lv2), padded (400,64) -> (512,128).
    w_enc2 = jnp.zeros((ENC1_PAD, ENC2_PAD), jnp.float32)
    w_enc2 = w_enc2.at[:HID_DIM, :z_dim].set(p["w_mu2"])
    w_enc2 = w_enc2.at[HID_DIM:2 * HID_DIM, z_dim:2 * z_dim].set(p["w_lv2"])
    b_enc2 = jnp.zeros((1, ENC2_PAD), jnp.float32)
    b_enc2 = b_enc2.at[:, :z_dim].set(p["b_mu2"])
    b_enc2 = b_enc2.at[:, z_dim:2 * z_dim].set(p["b_lv2"])

    # Decoder layer 1: (z, 200) -> (z, 256).
    w_d1 = jnp.zeros((z_dim, DEC1_PAD), jnp.float32)
    w_d1 = w_d1.at[:, :HID_DIM].set(p["w_d1"])
    b_d1 = jnp.zeros((1, DEC1_PAD), jnp.float32)
    b_d1 = b_d1.at[:, :HID_DIM].set(p["b_d1"])

    # Decoder layer 2: (200, 560) -> (256, 640); pad lanes give sigmoid(0)=0.5,
    # never read back.
    w_d2 = jnp.zeros((DEC1_PAD, OUT_PAD), jnp.float32)
    w_d2 = w_d2.at[:HID_DIM, :IN_DIM].set(p["w_d2"])
    b_d2 = jnp.zeros((1, OUT_PAD), jnp.float32)
    b_d2 = b_d2.at[:, :IN_DIM].set(p["b_d2"])

    return {
        "w_enc1": w_enc1.astype(jnp.bfloat16), "b_enc1": b_enc1,
        "w_enc2": w_enc2.astype(jnp.bfloat16), "b_enc2": b_enc2,
        "w_d1": w_d1.astype(jnp.bfloat16), "b_d1": b_d1,
        "w_d2": w_d2.astype(jnp.bfloat16), "b_d2": b_d2,
    }


def vae_reference(x, eps, p):
    """Pure-JAX f32 reference of the original (unfused) module."""
    relu = lambda t: jnp.maximum(t, 0.0)
    h_mu = relu(x @ p["w_mu1"] + p["b_mu1"])
    mu = relu(h_mu @ p["w_mu2"] + p["b_mu2"])
    h_lv = relu(x @ p["w_lv1"] + p["b_lv1"])
    logvar = relu(h_lv @ p["w_lv2"] + p["b_lv2"])
    lat = eps * jnp.exp(0.5 * logvar) + mu
    h_d = relu(lat @ p["w_d1"] + p["b_d1"])
    recon = jax.nn.sigmoid(h_d @ p["w_d2"] + p["b_d2"])
    return recon, mu, logvar


if __name__ == "__main__":
    z_dim = 32
    batch = 8

    root = jax.random.PRNGKey(0)
    k_param, k_x, k_eps = jax.random.split(root, 3)

    params = init_params(k_param, z_dim)
    fused = fuse_params(params, z_dim)

    # Input that the module would .view(-1, 560); here already flat (B, 560).
    x = jax.random.uniform(k_x, (batch, IN_DIM), jnp.float32)
    # eps ~ N(0, 1), same role as torch.normal(...) in reparameterize().
    eps = jax.random.normal(k_eps, (batch, z_dim), jnp.float32)

    recon, mu, logvar = vae_forward(x, eps, fused, z_dim)
    jax.block_until_ready((recon, mu, logvar))

    assert recon.shape == (batch, IN_DIM)
    assert mu.shape == (batch, z_dim)
    assert logvar.shape == (batch, z_dim)
    assert bool(jnp.all(jnp.isfinite(recon.astype(jnp.float32))))
    assert bool(jnp.all((recon >= 0.0) & (recon <= 1.0)))  # sigmoid range
    assert bool(jnp.all(mu >= 0.0)) and bool(jnp.all(logvar >= 0.0))  # post-ReLU

    # Numerical check vs. the f32 reference (bf16 weights + bf16 recon -> loose tol).
    r_ref, m_ref, lv_ref = vae_reference(x, eps, params)
    assert bool(jnp.max(jnp.abs(recon.astype(jnp.float32) - r_ref)) < 5e-2)
    assert bool(jnp.max(jnp.abs(mu - m_ref)) < 5e-2)
    assert bool(jnp.max(jnp.abs(logvar - lv_ref)) < 5e-2)

    print("KERNEL_OK")
</pallas_src>

<mosaic_0001>
module attributes {stable_mosaic.version = 11 : i64} {
  func.func @_vae_kernel(%arg0: i32, %arg1: memref<8x560xbf16, #tpu.memory_space<vmem>>, %arg2: memref<8x32xf32, #tpu.memory_space<vmem>>, %arg3: memref<560x512xbf16, #tpu.memory_space<vmem>>, %arg4: memref<1x512xf32, #tpu.memory_space<vmem>>, %arg5: memref<512x128xbf16, #tpu.memory_space<vmem>>, %arg6: memref<1x128xf32, #tpu.memory_space<vmem>>, %arg7: memref<32x256xbf16, #tpu.memory_space<vmem>>, %arg8: memref<1x256xf32, #tpu.memory_space<vmem>>, %arg9: memref<256x640xbf16, #tpu.memory_space<vmem>>, %arg10: memref<1x640xf32, #tpu.memory_space<vmem>>, %arg11: memref<8x640xbf16, #tpu.memory_space<vmem>>, %arg12: memref<8x128xf32, #tpu.memory_space<vmem>>) attributes {dimension_semantics = [#tpu.dimension_semantics<parallel>], iteration_bounds = array<i64: 1>, scalar_prefetch = 0 : i64, scratch_operands = 0 : i64, tpu.core_type = #tpu.core_type<tc>, window_params = [{transform_indices = @transform_0, window_bounds = array<i64: 8, 560>}, {transform_indices = @transform_1, window_bounds = array<i64: 8, 32>}, {pipeline_mode = #tpu.pipeline_mode<synchronous>, transform_indices = @transform_2, window_bounds = array<i64: 560, 512>}, {pipeline_mode = #tpu.pipeline_mode<synchronous>, transform_indices = @transform_3, window_bounds = array<i64: 1, 512>}, {pipeline_mode = #tpu.pipeline_mode<synchronous>, transform_indices = @transform_4, window_bounds = array<i64: 512, 128>}, {pipeline_mode = #tpu.pipeline_mode<synchronous>, transform_indices = @transform_5, window_bounds = array<i64: 1, 128>}, {pipeline_mode = #tpu.pipeline_mode<synchronous>, transform_indices = @transform_6, window_bounds = array<i64: 32, 256>}, {pipeline_mode = #tpu.pipeline_mode<synchronous>, transform_indices = @transform_7, window_bounds = array<i64: 1, 256>}, {pipeline_mode = #tpu.pipeline_mode<synchronous>, transform_indices = @transform_8, window_bounds = array<i64: 256, 640>}, {pipeline_mode = #tpu.pipeline_mode<synchronous>, transform_indices = @transform_9, window_bounds = array<i64: 1, 640>}, {transform_indices = @transform_10, window_bounds = array<i64: 8, 640>}, {transform_indices = @transform_11, window_bounds = array<i64: 8, 128>}]} {
    %c0 = arith.constant 0 : index
    %c0_0 = arith.constant 0 : index
    %0 = vector.load %arg1[%c0, %c0_0] : memref<8x560xbf16, #tpu.memory_space<vmem>>, vector<8x560xbf16>
    %c0_1 = arith.constant 0 : index
    %c0_2 = arith.constant 0 : index
    %1 = vector.load %arg3[%c0_1, %c0_2] : memref<560x512xbf16, #tpu.memory_space<vmem>>, vector<560x512xbf16>
    %cst = arith.constant dense<0.000000e+00> : vector<8x512xf32>
    %2 = tpu.matmul %0, %1, %cst {dimension_numbers = #tpu.dot_dimension_numbers<[1], [0], [0], [1], [0, 0, 1, 1], [], []>} : vector<8x560xbf16>, vector<560x512xbf16>, vector<8x512xf32> -> vector<8x512xf32>
    %c0_3 = arith.constant 0 : index
    %c0_4 = arith.constant 0 : index
    %3 = vector.load %arg4[%c0_3, %c0_4] : memref<1x512xf32, #tpu.memory_space<vmem>>, vector<1x512xf32>
    %4 = vector.broadcast %3 : vector<1x512xf32> to vector<8x512xf32>
    %5 = arith.addf %2, %4 : vector<8x512xf32>
    %cst_5 = arith.constant 0.000000e+00 : f32
    %6 = vector.broadcast %cst_5 : f32 to vector<8x512xf32>
    %7 = arith.maximumf %5, %6 : vector<8x512xf32>
    %8 = arith.truncf %7 : vector<8x512xf32> to vector<8x512xbf16>
    %c0_6 = arith.constant 0 : index
    %c0_7 = arith.constant 0 : index
    %9 = vector.load %arg5[%c0_6, %c0_7] : memref<512x128xbf16, #tpu.memory_space<vmem>>, vector<512x128xbf16>
    %cst_8 = arith.constant dense<0.000000e+00> : vector<8x128xf32>
    %10 = tpu.matmul %8, %9, %cst_8 {dimension_numbers = #tpu.dot_dimension_numbers<[1], [0], [0], [1], [0, 0, 1, 1], [], []>} : vector<8x512xbf16>, vector<512x128xbf16>, vector<8x128xf32> -> vector<8x128xf32>
    %c0_9 = arith.constant 0 : index
    %c0_10 = arith.constant 0 : index
    %11 = vector.load %arg6[%c0_9, %c0_10] : memref<1x128xf32, #tpu.memory_space<vmem>>, vector<1x128xf32>
    %12 = vector.broadcast %11 : vector<1x128xf32> to vector<8x128xf32>
    %13 = arith.addf %10, %12 : vector<8x128xf32>
    %cst_11 = arith.constant 0.000000e+00 : f32
    %14 = vector.broadcast %cst_11 : f32 to vector<8x128xf32>
    %15 = arith.maximumf %13, %14 : vector<8x128xf32>
    %c0_12 = arith.constant 0 : index
    %c0_13 = arith.constant 0 : index
    %16 = vector.load %arg12[%c0_12, %c0_13] : memref<8x128xf32, #tpu.memory_space<vmem>>, vector<8x128xf32>
    tpu.vector_store %arg12[%c0_12, %c0_13], %15 {strides = array<i32>} : memref<8x128xf32, #tpu.memory_space<vmem>>, vector<8x128xf32>,
    %17 = vector.extract_strided_slice %15 {offsets = [0, 0], sizes = [8, 32], strides = [1, 1]} : vector<8x128xf32> to vector<8x32xf32>
    %18 = vector.extract_strided_slice %15 {offsets = [0, 32], sizes = [8, 32], strides = [1, 1]} : vector<8x128xf32> to vector<8x32xf32>
    %c0_14 = arith.constant 0 : index
    %c0_15 = arith.constant 0 : index
    %19 = vector.load %arg2[%c0_14, %c0_15] : memref<8x32xf32, #tpu.memory_space<vmem>>, vector<8x32xf32>
    %cst_16 = arith.constant 5.000000e-01 : f32
    %20 = vector.broadcast %cst_16 : f32 to vector<8x32xf32>
    %21 = arith.mulf %20, %18 : vector<8x32xf32>
    %22 = math.exp %21 : vector<8x32xf32>
    %23 = arith.mulf %19, %22 : vector<8x32xf32>
    %24 = arith.addf %23, %17 : vector<8x32xf32>
    %25 = arith.truncf %24 : vector<8x32xf32> to vector<8x32xbf16>
    %c0_17 = arith.constant 0 : index
    %c0_18 = arith.constant 0 : index
    %26 = vector.load %arg7[%c0_17, %c0_18] : memref<32x256xbf16, #tpu.memory_space<vmem>>, vector<32x256xbf16>
    %cst_19 = arith.constant dense<0.000000e+00> : vector<8x256xf32>
    %27 = tpu.matmul %25, %26, %cst_19 {dimension_numbers = #tpu.dot_dimension_numbers<[1], [0], [0], [1], [0, 0, 1, 1], [], []>} : vector<8x32xbf16>, vector<32x256xbf16>, vector<8x256xf32> -> vector<8x256xf32>
    %c0_20 = arith.constant 0 : index
    %c0_21 = arith.constant 0 : index
    %28 = vector.load %arg8[%c0_20, %c0_21] : memref<1x256xf32, #tpu.memory_space<vmem>>, vector<1x256xf32>
    %29 = vector.broadcast %28 : vector<1x256xf32> to vector<8x256xf32>
    %30 = arith.addf %27, %29 : vector<8x256xf32>
    %cst_22 = arith.constant 0.000000e+00 : f32
    %31 = vector.broadcast %cst_22 : f32 to vector<8x256xf32>
    %32 = arith.maximumf %30, %31 : vector<8x256xf32>
    %33 = arith.truncf %32 : vector<8x256xf32> to vector<8x256xbf16>
    %c0_23 = arith.constant 0 : index
    %c0_24 = arith.constant 0 : index
    %34 = vector.load %arg9[%c0_23, %c0_24] : memref<256x640xbf16, #tpu.memory_space<vmem>>, vector<256x640xbf16>
    %cst_25 = arith.constant dense<0.000000e+00> : vector<8x640xf32>
    %35 = tpu.matmul %33, %34, %cst_25 {dimension_numbers = #tpu.dot_dimension_numbers<[1], [0], [0], [1], [0, 0, 1, 1], [], []>} : vector<8x256xbf16>, vector<256x640xbf16>, vector<8x640xf32> -> vector<8x640xf32>
    %c0_26 = arith.constant 0 : index
    %c0_27 = arith.constant 0 : index
    %36 = vector.load %arg10[%c0_26, %c0_27] : memref<1x640xf32, #tpu.memory_space<vmem>>, vector<1x640xf32>
    %37 = vector.broadcast %36 : vector<1x640xf32> to vector<8x640xf32>
    %38 = arith.addf %35, %37 : vector<8x640xf32>
    %cst_28 = arith.constant 0.000000e+00 : f32
    %39 = vector.broadcast %cst_28 : f32 to vector<8x640xf32>
    %40 = arith.subf %39, %38 : vector<8x640xf32>
    %41 = math.exp %40 : vector<8x640xf32>
    %cst_29 = arith.constant 1.000000e+00 : f32
    %42 = vector.broadcast %cst_29 : f32 to vector<8x640xf32>
    %43 = arith.addf %42, %41 : vector<8x640xf32>
    %44 = tpu.reciprocal %43 {approx = true} : vector<8x640xf32> -> vector<8x640xf32>
    %cst_30 = arith.constant 0.000000e+00 : f32
    %cst_31 = arith.constant 1.000000e+00 : f32
    %45 = vector.broadcast %cst_30 : f32 to vector<8x640xf32>
    %46 = arith.maximumf %45, %44 : vector<8x640xf32>
    %47 = vector.broadcast %cst_31 : f32 to vector<8x640xf32>
    %48 = arith.minimumf %47, %46 : vector<8x640xf32>
    %49 = arith.truncf %48 : vector<8x640xf32> to vector<8x640xbf16>
    %c0_32 = arith.constant 0 : index
    %c0_33 = arith.constant 0 : index
    %50 = vector.load %arg11[%c0_32, %c0_33] : memref<8x640xbf16, #tpu.memory_space<vmem>>, vector<8x640xbf16>
    tpu.vector_store %arg11[%c0_32, %c0_33], %49 {strides = array<i32>} : memref<8x640xbf16, #tpu.memory_space<vmem>>, vector<8x640xbf16>,
    return
  }
  func.func @transform_0(%arg0: i32) -> (i32, i32) {
    %c0_i32 = arith.constant 0 : i32
    %c0_i32_0 = arith.constant 0 : i32
    return %arg0, %c0_i32 : i32, i32
  }
  func.func @transform_1(%arg0: i32) -> (i32, i32) {
    %c0_i32 = arith.constant 0 : i32
    %c0_i32_0 = arith.constant 0 : i32
    return %arg0, %c0_i32 : i32, i32
  }
  func.func @transform_2(%arg0: i32) -> (i32, i32) {
    %c0_i32 = arith.constant 0 : i32
    %c0_i32_0 = arith.constant 0 : i32
    %c0_i32_1 = arith.constant 0 : i32
    return %c0_i32, %c0_i32_0 : i32, i32
  }
  func.func @transform_3(%arg0: i32) -> (i32, i32) {
    %c0_i32 = arith.constant 0 : i32
    %c0_i32_0 = arith.constant 0 : i32
    %c0_i32_1 = arith.constant 0 : i32
    return %c0_i32, %c0_i32_0 : i32, i32
  }
  func.func @transform_4(%arg0: i32) -> (i32, i32) {
    %c0_i32 = arith.constant 0 : i32
    %c0_i32_0 = arith.constant 0 : i32
    %c0_i32_1 = arith.constant 0 : i32
    return %c0_i32, %c0_i32_0 : i32, i32
  }
  func.func @transform_5(%arg0: i32) -> (i32, i32) {
    %c0_i32 = arith.constant 0 : i32
    %c0_i32_0 = arith.constant 0 : i32
    %c0_i32_1 = arith.constant 0 : i32
    return %c0_i32, %c0_i32_0 : i32, i32
  }
  func.func @transform_6(%arg0: i32) -> (i32, i32) {
    %c0_i32 = arith.constant 0 : i32
    %c0_i32_0 = arith.constant 0 : i32
    %c0_i32_1 = arith.constant 0 : i32
    return %c0_i32, %c0_i32_0 : i32, i32
  }
  func.func @transform_7(%arg0: i32) -> (i32, i32) {
    %c0_i32 = arith.constant 0 : i32
    %c0_i32_0 = arith.constant 0 : i32
    %c0_i32_1 = arith.constant 0 : i32
    return %c0_i32, %c0_i32_0 : i32, i32
  }
  func.func @transform_8(%arg0: i32) -> (i32, i32) {
    %c0_i32 = arith.constant 0 : i32
    %c0_i32_0 = arith.constant 0 : i32
    %c0_i32_1 = arith.constant 0 : i32
    return %c0_i32, %c0_i32_0 : i32, i32
  }
  func.func @transform_9(%arg0: i32) -> (i32, i32) {
    %c0_i32 = arith.constant 0 : i32
    %c0_i32_0 = arith.constant 0 : i32
    %c0_i32_1 = arith.constant 0 : i32
    return %c0_i32, %c0_i32_0 : i32, i32
  }
  func.func @transform_10(%arg0: i32) -> (i32, i32) {
    %c0_i32 = arith.constant 0 : i32
    %c0_i32_0 = arith.constant 0 : i32
    return %arg0, %c0_i32 : i32, i32
  }
  func.func @transform_11(%arg0: i32) -> (i32, i32) {
    %c0_i32 = arith.constant 0 : i32
    %c0_i32_0 = arith.constant 0 : i32
    return %arg0, %c0_i32 : i32, i32
  }
}

</mosaic_0001>

<bundles_post_ra>
// kernel: vae_forward.1
= control target key start
LH: loop header
LB: loop body
LE: loop exit
PB: predicated region body
PF: predicated region fallthrough
CT: control target
= control target key end

     0   :  { %17 = vsyncpa [#allocation3], 0  ;;  %s3958_s0 = inlined_call_operand.vmem [shape: bf16[8,560], index: 0, kind: input, shape index: {}]   ;;  %s3959_s1 = inlined_call_operand.vmem [shape: f32[8,32], index: 1, kind: input, shape index: {}]   ;;  %s3960_s2 = inlined_call_operand.hbm [shape: bf16[560,512], index: 2, kind: input, shape index: {}]   ;;  %s3961_s3 = inlined_call_operand.vmem [shape: f32[1,512], index: 3, kind: input, shape index: {}]   ;;  %s3962_s4 = inlined_call_operand.hbm [shape: bf16[512,128], index: 4, kind: input, shape index: {}]   ;;  %s3963_s5 = inlined_call_operand.vmem [shape: f32[1,128], index: 5, kind: input, shape index: {}]   ;;  %s3964_s6 = inlined_call_operand.vmem [shape: bf16[32,256], index: 6, kind: input, shape index: {}]   ;;  %s3965_s7 = inlined_call_operand.vmem [shape: f32[1,256], index: 7, kind: input, shape index: {}]   ;;  %s3966_s8 = inlined_call_operand.hbm [shape: bf16[256,640], index: 8, kind: input, shape index: {}]   ;;  %s3967_s9 = inlined_call_operand.vmem [shape: f32[1,640], index: 9, kind: input, shape index: {}]   ;;  %s3968_s10 = inlined_call_operand.hbm [shape: bf16[8,640], index: 10, kind: output, shape index: {0}]   ;;  %s3969_s11 = inlined_call_operand.vmem [shape: f32[8,128], index: 11, kind: output, shape index: {1}]  }
   0x1   :  { %18 = vsyncpa [#allocation6], 0  ;;  %s43_s19 = sshll.u32 %s3962_s4, 4  ;;  %s44_s19 = int_to_ptr.hbm [resolvable:$true] %s43_s19 }
   0x2   :  { %19 = vsyncpa [#allocation4], 0  ;;  %s3756_s20 = smov [#allocation5]   ;;  %s28_s24 = sshll.u32 %s3960_s2, 4  ;;  %s29_s24 = int_to_ptr.hbm [resolvable:$true] %s28_s24 }
   0x3   :  { %s45_s21 = sshll.u32 %s3756_s20, 4  ;;  %s3757_s25 = smov 64   ;;  %s46_s21 = int_to_ptr.vmem [resolvable:$true] %s45_s21 }
   0x4   :  { %s3758_s26 = smov 4   ;;  %s3759_s27 = smov [#allocation2]  }
   0x5   :  { %51 = dma.hbm_to_vmem [thread:$0]  %s44_s19, 4096, %s46_s21, [#allocation6], %s3757_s25, %s3757_s25, %s3758_s26  }
   0x6   :  { %s30_s28 = sshll.u32 %s3759_s27, 4  ;;  %s3760_s29 = smov 256   ;;  %s31_s28 = int_to_ptr.vmem [resolvable:$true] %s30_s28 }
   0x7   :  { %s3761_s30 = smov 16   ;;  %s62_s13 = sshll.u32 %s3966_s8, 4  ;;  %s63_s13 = int_to_ptr.hbm [resolvable:$true] %s62_s13 }
   0x8   :  { %36 = dma.hbm_to_vmem [thread:$0]  %s29_s24, 17920, %s31_s28, [#allocation3], %s3760_s29, %s3760_s29, %s3761_s30  }
   0x9   :  { %s3762_s14 = smov [#allocation7]   ;;  %s3763_s16 = smov 320  }
   0xa   :  { %s64_s15 = sshll.u32 %s3762_s14, 4  ;;  %s3764_s2 = smov 20   ;;  %s65_s15 = int_to_ptr.vmem [resolvable:$true] %s64_s15 }
   0xb   :  { %70 = dma.hbm_to_vmem [thread:$0]  %s63_s13, 10240, %s65_s15, [#allocation6], %s3763_s16, %s3763_s16, %s3764_s2  }
   0xc   :  { %3750 = dma.done.wait [#allocation3], 17920  }
   0xd   :  { %3751 = vsyncadd [#allocation3], 4294949376 }
   0xe   :  { %3752 = dma.done.wait [#allocation6], 14336  }
   0xf   :  { %3753 = vsyncadd [#allocation6], 4294952960  ;;  %v2448_v0 = vld [vmem:[#allocation2 + $0xe0] sm:$0xf]  ;;  %v3394_v1 = vld [vmem:[#allocation2 + $0xec] sm:$0xf0] }
  0x10   :  { %v2576_v2 = vld [vmem:[#allocation2 + $0x1e0] sm:$0xf]  ;;  %v2449_v3 = vor.u32 %v3394_v1, %v2448_v0  ;;  %v3426_v4 = vld [vmem:[#allocation2 + $0x1ec] sm:$0xf0]  ;;  %vm956_vm0 = vcmask 392192   ;;  %s3765_s2 = smov 96  }
  0x11   :  { %v2704_v5 = vld [vmem:[#allocation2 + $0x2e0] sm:$0xf]  ;;  %v3458_v6 = vld [vmem:[#allocation2 + $0x2ec] sm:$0xf0]  ;;  %v2577_v7 = vor.u32 %v3426_v4, %v2576_v2  ;;  %vm1583_vm1 = vcmask 261120   ;;  %s2319_s23 = sshll.u32 %s3968_s10, 4  ;;  %s2320_s23 = int_to_ptr.hbm [resolvable:$true] %s2319_s23 }
  0x12   :  { %v2705_v8 = vor.u32 %v3458_v6, %v2704_v5  ;;  %v2832_v9 = vld [vmem:[#allocation2 + $0x3e0] sm:$0xf]  ;;  %v3490_v10 = vld [vmem:[#allocation2 + $0x3ec] sm:$0xf0]  ;;  %960 = vmatpush.bf16.msra.mxu0 %v2449_v3 }
  0x13   :  { %v2432_v11 = vld [vmem:[#allocation2 + $0xc0] sm:$0xf]  ;;  %v2833_v12 = vor.u32 %v3490_v10, %v2832_v9  ;;  %v3390_v13 = vld [vmem:[#allocation2 + $0xcc] sm:$0xf0]  ;;  %973 = vmatpush.bf16.msra.mxu1 %v2577_v7 }
  0x14   :  { %v2560_v14 = vld [vmem:[#allocation2 + $0x1c0] sm:$0xf]  ;;  %v3422_v15 = vld [vmem:[#allocation2 + $0x1cc] sm:$0xf0]  ;;  %986 = vmatpush.bf16.msra.mxu2 %v2705_v8  ;;  %v2433_v16 = vor.u32 %v3390_v13, %v2432_v11 }
  0x15   :  { %v2561_v17 = vor.u32 %v3422_v15, %v2560_v14  ;;  %v2688_v18 = vld [vmem:[#allocation2 + $0x2c0] sm:$0xf]  ;;  %v3454_v19 = vld [vmem:[#allocation2 + $0x2cc] sm:$0xf0]  ;;  %999 = vmatpush.bf16.msra.mxu3 %v2833_v12 }
  0x16   :  { %v2816_v20 = vld [vmem:[#allocation2 + $0x3c0] sm:$0xf]  ;;  %v2689_v21 = vor.u32 %v3454_v19, %v2688_v18  ;;  %v3486_v22 = vld [vmem:[#allocation2 + $0x3cc] sm:$0xf0]  ;;  %961 = vmatpush.bf16.msra.mxu0 %v2433_v16 }
  0x17   :  { %v2416_v23 = vld [vmem:[#allocation2 + $0xa0] sm:$0xf]  ;;  %v3386_v24 = vld [vmem:[#allocation2 + $0xac] sm:$0xf0]  ;;  %v2817_v25 = vor.u32 %v3486_v22, %v2816_v20  ;;  %974 = vmatpush.bf16.msra.mxu1 %v2561_v17 }
  0x18   :  { %v2544_v26 = vld [vmem:[#allocation2 + $0x1a0] sm:$0xf]  ;;  %v3418_v27 = vld [vmem:[#allocation2 + $0x1ac] sm:$0xf0]  ;;  %v2417_v29 = vor.u32 %v3386_v24, %v2416_v23  ;;  %987 = vmatpush.bf16.msra.mxu2 %v2689_v21 }
  0x19   :  { %v2672_v28 = vld [vmem:[#allocation2 + $0x2a0] sm:$0xf]  ;;  %v3450_v30 = vld [vmem:[#allocation2 + $0x2ac] sm:$0xf0]  ;;  %v2545_v33 = vor.u32 %v3418_v27, %v2544_v26  ;;  %1000 = vmatpush.bf16.msra.mxu3 %v2817_v25 }
  0x1a   :  { %v2800_v31 = vld [vmem:[#allocation2 + $0x3a0] sm:$0xf]  ;;  %v3482_v32 = vld [vmem:[#allocation2 + $0x3ac] sm:$0xf0]  ;;  %v2673_v34 = vor.u32 %v3450_v30, %v2672_v28  ;;  %962 = vmatpush.bf16.msra.mxu0 %v2417_v29 }
  0x1b   :  { %v2400_v35 = vld [vmem:[#allocation2 + $0x80] sm:$0xf]  ;;  %v3382_v36 = vld [vmem:[#allocation2 + $0x8c] sm:$0xf0]  ;;  %v2801_v38 = vor.u32 %v3482_v32, %v2800_v31  ;;  %975 = vmatpush.bf16.msra.mxu1 %v2545_v33  ;;  %v3392_v31 = vld [vmem:[#allocation2 + $0xe4] sm:$0xf] }
  0x1c   :  { %v2528_v37 = vld [vmem:[#allocation2 + $0x180] sm:$0xf]  ;;  %v3414_v39 = vld [vmem:[#allocation2 + $0x18c] sm:$0xf0]  ;;  %v2401_v44 = vor.u32 %v3382_v36, %v2400_v35  ;;  %988 = vmatpush.bf16.msra.mxu2 %v2673_v34  ;;  %v2450_v32 = vld [vmem:[#allocation2 + $0xf0] sm:$0xf0] }
  0x1d   :  { %v2656_v40 = vld [vmem:[#allocation2 + $0x280] sm:$0xf]  ;;  %v3446_v41 = vld [vmem:[#allocation2 + $0x28c] sm:$0xf0]  ;;  %v2529_v45 = vor.u32 %v3414_v39, %v2528_v37  ;;  %1001 = vmatpush.bf16.msra.mxu3 %v2801_v38  ;;  %v3424_v34 = vld [vmem:[#allocation2 + $0x1e4] sm:$0xf] }
  0x1e   :  { %v2784_v42 = vld [vmem:[#allocation2 + $0x380] sm:$0xf]  ;;  %v3478_v43 = vld [vmem:[#allocation2 + $0x38c] sm:$0xf0]  ;;  %v2657_v46 = vor.u32 %v3446_v41, %v2656_v40  ;;  %963 = vmatpush.bf16.msra.mxu0 %v2401_v44  ;;  %v2578_v35 = vld [vmem:[#allocation2 + $0x1f0] sm:$0xf0] }
  0x1f   :  { %v2384_v47 = vld [vmem:[#allocation2 + $0x60] sm:$0xf]  ;;  %v3378_v48 = vld [vmem:[#allocation2 + $0x6c] sm:$0xf0]  ;;  %v2785_v50 = vor.u32 %v3478_v43, %v2784_v42  ;;  %976 = vmatpush.bf16.msra.mxu1 %v2529_v45  ;;  %v87_v37 = vld [vmem:[%s3958_s0 + $0x8] sm:$0xff] }
  0x20   :  { %v2512_v49 = vld [vmem:[#allocation2 + $0x160] sm:$0xf]  ;;  %v3410_v51 = vld [vmem:[#allocation2 + $0x16c] sm:$0xf0]  ;;  %v2385_v56 = vor.u32 %v3378_v48, %v2384_v47  ;;  %989 = vmatpush.bf16.msra.mxu2 %v2657_v46  ;;  %v3456_v40 = vld [vmem:[#allocation2 + $0x2e4] sm:$0xf]  ;;  %v244_v42 = vunpack.c.l.b16 %v87_v37  ;;  %v245_v43 = vunpack.c.h.b16 %v87_v37  ;;  %v2453_v47 = vor.u32 %v3392_v31, %v2450_v32 }
  0x21   :  { %v2640_v52 = vld [vmem:[#allocation2 + $0x260] sm:$0xf]  ;;  %v3442_v53 = vld [vmem:[#allocation2 + $0x26c] sm:$0xf0]  ;;  %v2513_v57 = vor.u32 %v3410_v51, %v2512_v49  ;;  %1002 = vmatpush.bf16.msra.mxu3 %v2785_v50  ;;  %v2706_v41 = vld [vmem:[#allocation2 + $0x2f0] sm:$0xf0]  ;;  %v2581_v48 = vor.u32 %v3424_v34, %v2578_v35 }
  0x22   :  { %v2768_v54 = vld [vmem:[#allocation2 + $0x360] sm:$0xf]  ;;  %v3474_v55 = vld [vmem:[#allocation2 + $0x36c] sm:$0xf0]  ;;  %v2641_v58 = vor.u32 %v3442_v53, %v2640_v52  ;;  %964 = vmatpush.bf16.msra.mxu0 %v2385_v56  ;;  %v3388_v51 = vld [vmem:[#allocation2 + $0xc4] sm:$0xf]  ;;  %v2709_v52 = vor.u32 %v3456_v40, %v2706_v41 }
  0x23   :  { %v2368_v59 = vld [vmem:[#allocation2 + $0x40] sm:$0xf]  ;;  %v3374_v60 = vld [vmem:[#allocation2 + $0x4c] sm:$0xf0]  ;;  %v2769_v62 = vor.u32 %v3474_v55, %v2768_v54  ;;  %977 = vmatpush.bf16.msra.mxu1 %v2513_v57  ;;  %v2434_v54 = vld [vmem:[#allocation2 + $0xd0] sm:$0xf0] }
  0x24   :  { %v2496_v61 = vld [vmem:[#allocation2 + $0x140] sm:$0xf]  ;;  %v3406_v63 = vld [vmem:[#allocation2 + $0x14c] sm:$0xf0]  ;;  %v2369_v4 = vor.u32 %v3374_v60, %v2368_v59  ;;  %990 = vmatpush.bf16.msra.mxu2 %v2641_v58  ;;  %v3420_v55 = vld [vmem:[#allocation2 + $0x1c4] sm:$0xf]  ;;  %v3844_v59 = vpack.c.b16 %v244_v42, %v244_v42  ;;  %v3846_v60 = vpack.c.b16 %v245_v43, %v245_v43 }
  0x25   :  { %v2624_v0 = vld [vmem:[#allocation2 + $0x240] sm:$0xf]  ;;  %v3438_v1 = vld [vmem:[#allocation2 + $0x24c] sm:$0xf0]  ;;  %v2497_v5 = vor.u32 %v3406_v63, %v2496_v61  ;;  %1003 = vmatpush.bf16.msra.mxu3 %v2769_v62  ;;  %v2562_v56 = vld [vmem:[#allocation2 + $0x1d0] sm:$0xf0] }
  0x26   :  { %v2752_v2 = vld [vmem:[#allocation2 + $0x340] sm:$0xf]  ;;  %v3470_v3 = vld [vmem:[#allocation2 + $0x34c] sm:$0xf0]  ;;  %v2625_v6 = vor.u32 %v3438_v1, %v2624_v0  ;;  %965 = vmatpush.bf16.msra.mxu0 %v2369_v4  ;;  %v3452_v57 = vld [vmem:[#allocation2 + $0x2c4] sm:$0xf]  ;;  %v2437_v0 = vor.u32 %v3388_v51, %v2434_v54  ;;  %v2565_v1 = vor.u32 %v3420_v55, %v2562_v56 }
  0x27   :  { %v2352_v7 = vld [vmem:[#allocation2 + $0x20] sm:$0xf]  ;;  %v3370_v8 = vld [vmem:[#allocation2 + $0x2c] sm:$0xf0]  ;;  %v2753_v10 = vor.u32 %v3470_v3, %v2752_v2  ;;  %978 = vmatpush.bf16.msra.mxu1 %v2497_v5  ;;  %v2690_v58 = vld [vmem:[#allocation2 + $0x2d0] sm:$0xf0] }
  0x28   :  { %v2480_v9 = vld [vmem:[#allocation2 + $0x120] sm:$0xf]  ;;  %v3402_v11 = vld [vmem:[#allocation2 + $0x12c] sm:$0xf0]  ;;  %v2353_v17 = vor.u32 %v3370_v8, %v2352_v7  ;;  %991 = vmatpush.bf16.msra.mxu2 %v2625_v6  ;;  %v3384_v3 = vld [vmem:[#allocation2 + $0xa4] sm:$0xf]  ;;  %v2693_v5 = vor.u32 %v3452_v57, %v2690_v58 }
  0x29   :  { %v2608_v12 = vld [vmem:[#allocation2 + $0x220] sm:$0xf]  ;;  %v3434_v13 = vld [vmem:[#allocation2 + $0x22c] sm:$0xf0]  ;;  %v2481_v21 = vor.u32 %v3402_v11, %v2480_v9  ;;  %1004 = vmatpush.bf16.msra.mxu3 %v2753_v10  ;;  %v2418_v4 = vld [vmem:[#allocation2 + $0xb0] sm:$0xf0] }
  0x2a   :  { %v2736_v14 = vld [vmem:[#allocation2 + $0x320] sm:$0xf]  ;;  %v3466_v15 = vld [vmem:[#allocation2 + $0x32c] sm:$0xf0]  ;;  %v2609_v22 = vor.u32 %v3434_v13, %v2608_v12  ;;  %966 = vmatpush.bf16.msra.mxu0 %v2353_v17  ;;  %v3416_v6 = vld [vmem:[#allocation2 + $0x1a4] sm:$0xf]  ;;  %v2421_v13 = vor.u32 %v3384_v3, %v2418_v4 }
  0x2b   :  { %v2336_v16 = vld [vmem:[#allocation2] sm:$0xf]  ;;  %v3366_v18 = vld [vmem:[#allocation2 + $0xc] sm:$0xf0]  ;;  %v2737_v26 = vor.u32 %v3466_v15, %v2736_v14  ;;  %979 = vmatpush.bf16.msra.mxu1 %v2481_v21  ;;  %v2546_v7 = vld [vmem:[#allocation2 + $0x1b0] sm:$0xf0] }
  0x2c   :  { %v2464_v19 = vld [vmem:[#allocation2 + $0x100] sm:$0xf]  ;;  %v3398_v20 = vld [vmem:[#allocation2 + $0x10c] sm:$0xf0]  ;;  %v2337_v33 = vor.u32 %v3366_v18, %v2336_v16  ;;  %992 = vmatpush.bf16.msra.mxu2 %v2609_v22  ;;  %v3448_v8 = vld [vmem:[#allocation2 + $0x2a4] sm:$0xf]  ;;  %v2549_v14 = vor.u32 %v3416_v6, %v2546_v7 }
  0x2d   :  { %v2592_v23 = vld [vmem:[#allocation2 + $0x200] sm:$0xf]  ;;  %v3430_v24 = vld [vmem:[#allocation2 + $0x20c] sm:$0xf0]  ;;  %v2465_v38 = vor.u32 %v3398_v20, %v2464_v19  ;;  %1005 = vmatpush.bf16.msra.mxu3 %v2737_v26  ;;  %v2674_v9 = vld [vmem:[#allocation2 + $0x2b0] sm:$0xf0] }
  0x2e   :  { %v86_v25 = vld [vmem:[%s3958_s0] sm:$0xff]  ;;  %v3462_v28 = vld [vmem:[#allocation2 + $0x30c] sm:$0xf0]  ;;  %v2593_v39 = vor.u32 %v3430_v24, %v2592_v23  ;;  %967 = vmatpush.bf16.msra.mxu0 %v2337_v33  ;;  %v2834_v11 = vld [vmem:[#allocation2 + $0x3f0] sm:$0xf0]  ;;  %v2677_v17 = vor.u32 %v3448_v8, %v2674_v9 }
  0x2f   :  { %v2720_v27 = vld [vmem:[#allocation2 + $0x300] sm:$0xf]  ;;  %v3502_v30 = vld [vmem:[#allocation2 + $0x44c] sm:$0xf0]  ;;  %v242_v36 = vunpack.c.l.b16 %v86_v25  ;;  %v243_v46 = vunpack.c.h.b16 %v86_v25  ;;  %980 = vmatpush.bf16.msra.mxu1 %v2465_v38  ;;  %v3488_v10 = vld [vmem:[#allocation2 + $0x3e4] sm:$0xf] }
  0x30   :  { %v2880_v29 = vld [vmem:[#allocation2 + $0x440] sm:$0xf]  ;;  %v2721_v44 = vor.u32 %v3462_v28, %v2720_v27  ;;  %v3498_v50 = vld [vmem:[#allocation2 + $0x42c] sm:$0xf0]  ;;  %993 = vmatpush.bf16.msra.mxu2 %v2593_v39  ;;  %v3380_v15 = vld [vmem:[#allocation2 + $0x84] sm:$0xf]  ;;  %v2837_v18 = vor.u32 %v3488_v10, %v2834_v11 }
  0x31   :  { %v2881_v45 = vor.u32 %v3502_v30, %v2880_v29  ;;  %v2864_v49 = vld [vmem:[#allocation2 + $0x420] sm:$0xf]  ;;  %v3842_v53 = vpack.c.b16 %v242_v36, %v242_v36  ;;  %v3848_v63 = vpack.c.b16 %v243_v46, %v243_v46  ;;  %v3494_v2 = vld [vmem:[#allocation2 + $0x40c] sm:$0xf0]  ;;  %v2402_v16 = vld [vmem:[#allocation2 + $0x90] sm:$0xf0] }
  0x32   :  { %1006 = vmatpush.bf16.msra.mxu3 %v2721_v44  ;;  %v2865_v61 = vor.u32 %v3498_v50, %v2864_v49  ;;  %v2848_v62 = vld [vmem:[#allocation2 + $0x400] sm:$0xf]  ;;  %v3412_v19 = vld [vmem:[#allocation2 + $0x184] sm:$0xf]  ;;  %v2530_v20 = vld [vmem:[#allocation2 + $0x190] sm:$0xf0]  ;;  %v2405_v26 = vor.u32 %v3380_v15, %v2402_v16 }
  0x33   :  { %1017 = vmatpush.bf16.msrb.mxu0 %v2881_v45  ;;  %1025 = vmatpush.bf16.msrb.mxu1 %v2453_v47  ;;  %v2849_v12 = vor.u32 %v3494_v2, %v2848_v62  ;;  %v3444_v21 = vld [vmem:[#allocation2 + $0x284] sm:$0xf]  ;;  %v2658_v22 = vld [vmem:[#allocation2 + $0x290] sm:$0xf0]  ;;  %v88_v25 = vld [vmem:[%s3958_s0 + $0x10] sm:$0xf]  ;;  %v2533_v27 = vor.u32 %v3412_v19, %v2530_v20 }
  0x34   :  { %1038 = vmatpush.bf16.msrb.mxu2 %v2581_v48  ;;  %968 = vmatmul.bf16.vlgmr.msra.gmra.mxu0 %v3842_v53  ;;  %v3484_v23 = vld [vmem:[#allocation2 + $0x3c4] sm:$0xf]  ;;  %v2818_v24 = vld [vmem:[#allocation2 + $0x3d0] sm:$0xf0]  ;;  %v2661_v30 = vor.u32 %v3444_v21, %v2658_v22  ;;  %v246_v38 = vunpack.c.l.b16 %v88_v25  ;;  %v2456_v16 = vld [vmem:[#allocation2 + $0xe8] sm:$0xf] }
  0x35   :  { %994 = vmatmul.bf16.vlgmr.msra.gmra.mxu2 %v3844_v59  ;;  %1007 = vmatmul.bf16.vlgmr.msra.gmra.mxu3 %v3846_v60  ;;  %v3376_v28 = vld [vmem:[#allocation2 + $0x64] sm:$0xf]  ;;  %v2386_v29 = vld [vmem:[#allocation2 + $0x70] sm:$0xf0]  ;;  %v2821_v31 = vor.u32 %v3484_v23, %v2818_v24  ;;  %v3427_v19 = vld [vmem:[#allocation2 + $0x1f4] sm:$0xf0] }
  0x36   :  { %1051 = vmatpush.bf16.msrb.mxu3 %v2709_v52  ;;  %981 = vmatmul.bf16.vlgmr.msra.gmra.mxu1 %v3848_v63  ;;  %v3408_v32 = vld [vmem:[#allocation2 + $0x164] sm:$0xf]  ;;  %v2514_v33 = vld [vmem:[#allocation2 + $0x170] sm:$0xf0]  ;;  %v2389_v39 = vor.u32 %v3376_v28, %v2386_v29  ;;  %v3857_v48 = vpack.c.b16 %v246_v38, %v246_v38 }
  0x37   :  { %1018 = vmatpush.bf16.msrb.mxu0 %v2865_v61  ;;  %1026 = vmatpush.bf16.msrb.mxu1 %v2437_v0  ;;  %v3440_v34 = vld [vmem:[#allocation2 + $0x264] sm:$0xf]  ;;  %v2642_v35 = vld [vmem:[#allocation2 + $0x270] sm:$0xf0]  ;;  %v2517_v40 = vor.u32 %v3408_v32, %v2514_v33  ;;  %v3391_v32 = vld [vmem:[#allocation2 + $0xd4] sm:$0xf0] }
  0x38   :  { %1039 = vmatpush.bf16.msrb.mxu2 %v2565_v1  ;;  %v3480_v36 = vld [vmem:[#allocation2 + $0x3a4] sm:$0xf]  ;;  %v2802_v37 = vld [vmem:[#allocation2 + $0x3b0] sm:$0xf0]  ;;  %v2645_v43 = vor.u32 %v3440_v34, %v2642_v35  ;;  %v2568_v33 = vld [vmem:[#allocation2 + $0x1c8] sm:$0xf] }
  0x39   :  { %v3372_v41 = vld [vmem:[#allocation2 + $0x44] sm:$0xf]  ;;  %v2370_v42 = vld [vmem:[#allocation2 + $0x50] sm:$0xf0]  ;;  %v2805_v44 = vor.u32 %v3480_v36, %v2802_v37  ;;  %v3423_v34 = vld [vmem:[#allocation2 + $0x1d4] sm:$0xf0] }
  0x3a   :  { %1052 = vmatpush.bf16.msrb.mxu3 %v2693_v5  ;;  %v3404_v45 = vld [vmem:[#allocation2 + $0x144] sm:$0xf]  ;;  %v2498_v46 = vld [vmem:[#allocation2 + $0x150] sm:$0xf0]  ;;  %v2373_v52 = vor.u32 %v3372_v41, %v2370_v42  ;;  %v2424_v42 = vld [vmem:[#allocation2 + $0xa8] sm:$0xf] }
  0x3b   :  { %1019 = vmatpush.bf16.msrb.mxu0 %v2849_v12  ;;  %1027 = vmatpush.bf16.msrb.mxu1 %v2421_v13  ;;  %v3436_v47 = vld [vmem:[#allocation2 + $0x244] sm:$0xf]  ;;  %v2626_v49 = vld [vmem:[#allocation2 + $0x250] sm:$0xf0]  ;;  %v2501_v54 = vor.u32 %v3404_v45, %v2498_v46  ;;  %v2552_v45 = vld [vmem:[#allocation2 + $0x1a8] sm:$0xf] }
  0x3c   :  { %1040 = vmatpush.bf16.msrb.mxu2 %v2549_v14  ;;  %v3476_v50 = vld [vmem:[#allocation2 + $0x384] sm:$0xf]  ;;  %v2786_v51 = vld [vmem:[#allocation2 + $0x390] sm:$0xf0]  ;;  %v2629_v57 = vor.u32 %v3436_v47, %v2626_v49  ;;  %v3419_v46 = vld [vmem:[#allocation2 + $0x1b4] sm:$0xf0] }
  0x3d   :  { %v3368_v55 = vld [vmem:[#allocation2 + $0x24] sm:$0xf]  ;;  %v2354_v56 = vld [vmem:[#allocation2 + $0x30] sm:$0xf0]  ;;  %v2789_v58 = vor.u32 %v3476_v50, %v2786_v51  ;;  %v2712_v50 = vld [vmem:[#allocation2 + $0x2e8] sm:$0xf] }
  0x3e   :  { %1053 = vmatpush.bf16.msrb.mxu3 %v2677_v17  ;;  %v3400_v61 = vld [vmem:[#allocation2 + $0x124] sm:$0xf]  ;;  %v2482_v62 = vld [vmem:[#allocation2 + $0x130] sm:$0xf0]  ;;  %v2357_v4 = vor.u32 %v3368_v55, %v2354_v56  ;;  %v3395_v17 = vld [vmem:[#allocation2 + $0xf4] sm:$0xf0] }
  0x3f   :  { %1064 = vmatpush.bf16.msra.mxu0 %v2837_v18  ;;  %1028 = vmatpush.bf16.msrb.mxu1 %v2405_v26  ;;  %v3432_v0 = vld [vmem:[#allocation2 + $0x224] sm:$0xf]  ;;  %v2610_v1 = vld [vmem:[#allocation2 + $0x230] sm:$0xf0]  ;;  %v2485_v5 = vor.u32 %v3400_v61, %v2482_v62  ;;  %v2584_v18 = vld [vmem:[#allocation2 + $0x1e8] sm:$0xf]  ;;  %v2457_v26 = vor.u32 %v3395_v17, %v2456_v16 }
  0x40   :  { %1041 = vmatpush.bf16.msrb.mxu2 %v2533_v27  ;;  %v3472_v2 = vld [vmem:[#allocation2 + $0x364] sm:$0xf]  ;;  %v2770_v3 = vld [vmem:[#allocation2 + $0x370] sm:$0xf0]  ;;  %v2613_v9 = vor.u32 %v3432_v0, %v2610_v1  ;;  %v2585_v27 = vor.u32 %v3427_v19, %v2584_v18  ;;  %v3459_v51 = vld [vmem:[#allocation2 + $0x2f4] sm:$0xf0] }
  0x41   :  { %v3364_v6 = vld [vmem:[#allocation2 + $0x4] sm:$0xf]  ;;  %v2338_v7 = vld [vmem:[#allocation2 + $0x10] sm:$0xf0]  ;;  %v2773_v10 = vor.u32 %v3472_v2, %v2770_v3  ;;  %v3491_v55 = vld [vmem:[#allocation2 + $0x3f4] sm:$0xf0]  ;;  %v2713_v62 = vor.u32 %v3459_v51, %v2712_v50 }
  0x42   :  { %1054 = vmatpush.bf16.msrb.mxu3 %v2661_v30  ;;  %v3396_v8 = vld [vmem:[#allocation2 + $0x104] sm:$0xf]  ;;  %v2466_v11 = vld [vmem:[#allocation2 + $0x110] sm:$0xf0]  ;;  %v2341_v20 = vor.u32 %v3364_v6, %v2338_v7  ;;  %v2440_v30 = vld [vmem:[#allocation2 + $0xc8] sm:$0xf] }
  0x43   :  { %1065 = vmatpush.bf16.msra.mxu0 %v2821_v31  ;;  %1029 = vmatpush.bf16.msrb.mxu1 %v2389_v39  ;;  %v3428_v12 = vld [vmem:[#allocation2 + $0x204] sm:$0xf]  ;;  %v2594_v13 = vld [vmem:[#allocation2 + $0x210] sm:$0xf0]  ;;  %v2469_v21 = vor.u32 %v3396_v8, %v2466_v11  ;;  %v2441_v39 = vor.u32 %v3391_v32, %v2440_v30  ;;  %v3383_v0 = vld [vmem:[#allocation2 + $0x94] sm:$0xf0] }
  0x44   :  { %1042 = vmatpush.bf16.msrb.mxu2 %v2517_v40  ;;  %2894 = vmatmul.msk.bf16.vlgmr.msrb.gmra.mxu0 %vm956_vm0, %v3857_v48  ;;  %v3468_v14 = vld [vmem:[#allocation2 + $0x344] sm:$0xf]  ;;  %v2754_v15 = vld [vmem:[#allocation2 + $0x350] sm:$0xf0]  ;;  %v2597_v24 = vor.u32 %v3428_v12, %v2594_v13  ;;  %v2569_v40 = vor.u32 %v3423_v34, %v2568_v33  ;;  %v2536_v1 = vld [vmem:[#allocation2 + $0x188] sm:$0xf] }
  0x45   :  { %v3500_v22 = vld [vmem:[#allocation2 + $0x444] sm:$0xf]  ;;  %v2882_v23 = vld [vmem:[#allocation2 + $0x450] sm:$0xf0]  ;;  %v2757_v25 = vor.u32 %v3468_v14, %v2754_v15  ;;  %v3415_v2 = vld [vmem:[#allocation2 + $0x194] sm:$0xf0] }
  0x46   :  { %1055 = vmatpush.bf16.msrb.mxu3 %v2645_v43  ;;  %v3464_v28 = vld [vmem:[#allocation2 + $0x324] sm:$0xf]  ;;  %v2738_v29 = vld [vmem:[#allocation2 + $0x330] sm:$0xf0]  ;;  %v2885_v31 = vor.u32 %v3500_v22, %v2882_v23  ;;  %v3387_v43 = vld [vmem:[#allocation2 + $0xb4] sm:$0xf0] }
  0x47   :  { %1066 = vmatpush.bf16.msra.mxu0 %v2805_v44  ;;  %1030 = vmatpush.bf16.msrb.mxu1 %v2373_v52  ;;  %v3496_v35 = vld [vmem:[#allocation2 + $0x424] sm:$0xf]  ;;  %v2866_v36 = vld [vmem:[#allocation2 + $0x430] sm:$0xf0]  ;;  %v2741_v37 = vor.u32 %v3464_v28, %v2738_v29  ;;  %v2425_v56 = vor.u32 %v3387_v43, %v2424_v42  ;;  %v2824_v6 = vld [vmem:[#allocation2 + $0x3c8] sm:$0xf] }
  0x48   :  { %1043 = vmatpush.bf16.msrb.mxu2 %v2501_v54  ;;  %v3460_v38 = vld [vmem:[#allocation2 + $0x304] sm:$0xf]  ;;  %v2722_v41 = vld [vmem:[#allocation2 + $0x310] sm:$0xf0]  ;;  %v2869_v44 = vor.u32 %v3496_v35, %v2866_v36  ;;  %v2840_v54 = vld [vmem:[#allocation2 + $0x3e8] sm:$0xf] }
  0x49   :  { %v3492_v47 = vld [vmem:[#allocation2 + $0x404] sm:$0xf]  ;;  %v2850_v49 = vld [vmem:[#allocation2 + $0x410] sm:$0xf0]  ;;  %v2725_v52 = vor.u32 %v3460_v38, %v2722_v41  ;;  %v2841_v3 = vor.u32 %v3491_v55, %v2840_v54  ;;  %v3487_v7 = vld [vmem:[#allocation2 + $0x3d4] sm:$0xf0] }
  0x4a   :  { %1056 = vmatpush.bf16.msrb.mxu3 %v2629_v57  ;;  %v2553_v57 = vor.u32 %v3419_v46, %v2552_v45  ;;  %v2853_v61 = vor.u32 %v3492_v47, %v2850_v49  ;;  %v3379_v12 = vld [vmem:[#allocation2 + $0x74] sm:$0xf0]  ;;  %v2520_v13 = vld [vmem:[#allocation2 + $0x168] sm:$0xf]  ;;  %v2825_v15 = vor.u32 %v3487_v7, %v2824_v6 }
  0x4b   :  { %1067 = vmatpush.bf16.msra.mxu0 %v2789_v58  ;;  %1031 = vmatpush.bf16.msrb.mxu1 %v2357_v4  ;;  %v2408_v58 = vld [vmem:[#allocation2 + $0x88] sm:$0xf]  ;;  %v3411_v14 = vld [vmem:[#allocation2 + $0x174] sm:$0xf0] }
  0x4c   :  { %1044 = vmatpush.bf16.msrb.mxu2 %v2485_v5  ;;  %v2696_v4 = vld [vmem:[#allocation2 + $0x2c8] sm:$0xf]  ;;  %v3455_v5 = vld [vmem:[#allocation2 + $0x2d4] sm:$0xf0]  ;;  %v2409_v8 = vor.u32 %v3383_v0, %v2408_v58  ;;  %v2521_v19 = vor.u32 %v3411_v14, %v2520_v13  ;;  %v3393_v58 = vld [vmem:[#allocation2 + $0xec] sm:$0xf] }
  0x4d   :  { %v2697_v11 = vor.u32 %v3455_v5, %v2696_v4  ;;  %v2680_v16 = vld [vmem:[#allocation2 + $0x2a8] sm:$0xf]  ;;  %v3451_v17 = vld [vmem:[#allocation2 + $0x2b4] sm:$0xf0] }
  0x4e   :  { %1057 = vmatpush.bf16.msrb.mxu3 %v2613_v9  ;;  %v2537_v9 = vor.u32 %v3415_v2, %v2536_v1  ;;  %v2376_v22 = vld [vmem:[#allocation2 + $0x48] sm:$0xf]  ;;  %v2681_v23 = vor.u32 %v3451_v17, %v2680_v16  ;;  %v3447_v28 = vld [vmem:[#allocation2 + $0x294] sm:$0xf0] }
  0x4f   :  { %1068 = vmatpush.bf16.msra.mxu0 %v2773_v10  ;;  %1032 = vmatpush.bf16.msrb.mxu1 %v2341_v20  ;;  %v2392_v10 = vld [vmem:[#allocation2 + $0x68] sm:$0xf]  ;;  %v3479_v33 = vld [vmem:[#allocation2 + $0x394] sm:$0xf0] }
  0x50   :  { %1045 = vmatpush.bf16.msrb.mxu2 %v2469_v21  ;;  %v2393_v18 = vor.u32 %v3379_v12, %v2392_v10  ;;  %v2808_v20 = vld [vmem:[#allocation2 + $0x3a8] sm:$0xf]  ;;  %v3483_v21 = vld [vmem:[#allocation2 + $0x3b4] sm:$0xf0]  ;;  %v2442_v12 = vld [vmem:[#allocation2 + $0xd8] sm:$0xf0] }
  0x51   :  { %v2809_v29 = vor.u32 %v3483_v21, %v2808_v20  ;;  %v2792_v32 = vld [vmem:[#allocation2 + $0x388] sm:$0xf]  ;;  %v3371_v36 = vld [vmem:[#allocation2 + $0x34] sm:$0xf0] }
  0x52   :  { %1058 = vmatpush.bf16.msrb.mxu3 %v2597_v24  ;;  %1033 = vmatmul.bf16.vlgmr.msrb.gmra.mxu1 %v3842_v53  ;;  %v3375_v24 = vld [vmem:[#allocation2 + $0x54] sm:$0xf0]  ;;  %v2360_v34 = vld [vmem:[#allocation2 + $0x28] sm:$0xf]  ;;  %v2793_v41 = vor.u32 %v3479_v33, %v2792_v32  ;;  %v3457_v33 = vld [vmem:[#allocation2 + $0x2ec] sm:$0xf] }
  0x53   :  { %1069 = vmatpush.bf16.msra.mxu0 %v2757_v25  ;;  %1082 = vmatpush.bf16.msra.mxu1 %v2885_v31  ;;  %v2504_v25 = vld [vmem:[#allocation2 + $0x148] sm:$0xf]  ;;  %v2377_v30 = vor.u32 %v3375_v24, %v2376_v22  ;;  %v3403_v38 = vld [vmem:[#allocation2 + $0x134] sm:$0xf0]  ;;  %v2361_v43 = vor.u32 %v3371_v36, %v2360_v34  ;;  %v3385_v22 = vld [vmem:[#allocation2 + $0xac] sm:$0xf] }
  0x54   :  { %1090 = vmatpush.bf16.msra.mxu2 %v2457_v26  ;;  %v3407_v26 = vld [vmem:[#allocation2 + $0x154] sm:$0xf0]  ;;  %v2776_v42 = vld [vmem:[#allocation2 + $0x368] sm:$0xf]  ;;  %v2714_v34 = vld [vmem:[#allocation2 + $0x2f8] sm:$0xf0] }
  0x55   :  { %1046 = vmatmul.bf16.vlgmr.msrb.gmra.mxu2 %v3848_v63  ;;  %1059 = vmatmul.bf16.vlgmr.msrb.gmra.mxu3 %v3844_v59  ;;  %v2505_v31 = vor.u32 %v3407_v26, %v2504_v25  ;;  %v3475_v45 = vld [vmem:[#allocation2 + $0x374] sm:$0xf0]  ;;  %v2344_v46 = vld [vmem:[#allocation2 + $0x8] sm:$0xf]  ;;  %v3425_v26 = vld [vmem:[#allocation2 + $0x1ec] sm:$0xf] }
  0x56   :  { %1103 = vmatpush.bf16.msra.mxu3 %v2585_v27  ;;  %v2664_v27 = vld [vmem:[#allocation2 + $0x288] sm:$0xf]  ;;  %v3367_v47 = vld [vmem:[#allocation2 + $0x14] sm:$0xf0] }
  0x57   :  { %1070 = vmatpush.bf16.msra.mxu0 %v2741_v37  ;;  %1083 = vmatpush.bf16.msra.mxu1 %v2869_v44  ;;  %v2665_v35 = vor.u32 %v3447_v28, %v2664_v27  ;;  %v2488_v37 = vld [vmem:[#allocation2 + $0x128] sm:$0xf]  ;;  %v3399_v51 = vld [vmem:[#allocation2 + $0x114] sm:$0xf0]  ;;  %v2586_v27 = vld [vmem:[#allocation2 + $0x1f8] sm:$0xf0] }
  0x58   :  { %1091 = vmatpush.bf16.msra.mxu2 %v2441_v39  ;;  %v2648_v39 = vld [vmem:[#allocation2 + $0x268] sm:$0xf]  ;;  %v2489_v44 = vor.u32 %v3403_v38, %v2488_v37  ;;  %v3439_v54 = vld [vmem:[#allocation2 + $0x254] sm:$0xf0]  ;;  %v2589_v36 = vor.u32 %v3425_v26, %v2586_v27  ;;  %v3381_v37 = vld [vmem:[#allocation2 + $0x8c] sm:$0xf] }
  0x59   :  { %v2472_v50 = vld [vmem:[#allocation2 + $0x108] sm:$0xf]  ;;  %v3471_v2 = vld [vmem:[#allocation2 + $0x354] sm:$0xf0]  ;;  %v3365_v27 = vld [vmem:[#allocation2 + $0xc] sm:$0xf] }
  0x5a   :  { %1104 = vmatpush.bf16.msra.mxu3 %v2569_v40  ;;  %v3443_v40 = vld [vmem:[#allocation2 + $0x274] sm:$0xf0]  ;;  %v2888_v55 = vld [vmem:[#allocation2 + $0x448] sm:$0xf]  ;;  %v2473_v0 = vor.u32 %v3399_v51, %v2472_v50  ;;  %v3377_v51 = vld [vmem:[#allocation2 + $0x6c] sm:$0xf] }
  0x5b   :  { %1071 = vmatpush.bf16.msra.mxu0 %v2725_v52  ;;  %1084 = vmatpush.bf16.msra.mxu1 %v2853_v61  ;;  %v2649_v49 = vor.u32 %v3443_v40, %v2648_v39  ;;  %v2632_v52 = vld [vmem:[#allocation2 + $0x248] sm:$0xf]  ;;  %v2458_v61 = vld [vmem:[#allocation2 + $0xf8] sm:$0xf0]  ;;  %v3435_v7 = vld [vmem:[#allocation2 + $0x234] sm:$0xf0] }
  0x5c   :  { %1092 = vmatpush.bf16.msra.mxu2 %v2425_v56  ;;  %v3503_v56 = vld [vmem:[#allocation2 + $0x454] sm:$0xf0]  ;;  %v2760_v1 = vld [vmem:[#allocation2 + $0x348] sm:$0xf]  ;;  %v2461_v6 = vor.u32 %v3393_v58, %v2458_v61  ;;  %v2410_v40 = vld [vmem:[#allocation2 + $0x98] sm:$0xf0] }
  0x5d   :  { %v2889_v4 = vor.u32 %v3503_v56, %v2888_v55  ;;  %v2616_v5 = vld [vmem:[#allocation2 + $0x228] sm:$0xf]  ;;  %v2761_v10 = vor.u32 %v3471_v2, %v2760_v1  ;;  %v3467_v14 = vld [vmem:[#allocation2 + $0x334] sm:$0xf0]  ;;  %v3417_v55 = vld [vmem:[#allocation2 + $0x1ac] sm:$0xf] }
  0x5e   :  { %1105 = vmatpush.bf16.msra.mxu3 %v2553_v57  ;;  %1072 = vmatmul.bf16.vlgmr.msra.gmra.mxu0 %v3846_v60  ;;  %v2777_v57 = vor.u32 %v3475_v45, %v2776_v42  ;;  %v2744_v13 = vld [vmem:[#allocation2 + $0x328] sm:$0xf]  ;;  %v3495_v21 = vld [vmem:[#allocation2 + $0x414] sm:$0xf0]  ;;  %v2570_v42 = vld [vmem:[#allocation2 + $0x1d8] sm:$0xf0] }
  0x5f   :  { %1116 = vmatpush.bf16.msrb.mxu0 %v2713_v62  ;;  %1129 = vmatpush.bf16.msrb.mxu1 %v2841_v3  ;;  %v2345_v62 = vor.u32 %v3367_v47, %v2344_v46  ;;  %v2633_v3 = vor.u32 %v3439_v54, %v2632_v52  ;;  %v2600_v17 = vld [vmem:[#allocation2 + $0x208] sm:$0xf]  ;;  %v2745_v24 = vor.u32 %v3467_v14, %v2744_v13  ;;  %v3463_v28 = vld [vmem:[#allocation2 + $0x314] sm:$0xf0]  ;;  %v2826_v45 = vld [vmem:[#allocation2 + $0x3d8] sm:$0xf0] }
  0x60   :  { %1093 = vmatpush.bf16.msra.mxu2 %v2409_v8  ;;  %v2872_v8 = vld [vmem:[#allocation2 + $0x428] sm:$0xf]  ;;  %v3453_v46 = vld [vmem:[#allocation2 + $0x2cc] sm:$0xf]  ;;  %v2698_v47 = vld [vmem:[#allocation2 + $0x2d8] sm:$0xf0] }
  0x61   :  { %v2728_v25 = vld [vmem:[#allocation2 + $0x308] sm:$0xf]  ;;  %v2394_v54 = vld [vmem:[#allocation2 + $0x78] sm:$0xf0]  ;;  %v3481_v58 = vld [vmem:[#allocation2 + $0x3ac] sm:$0xf] }
  0x62   :  { %1106 = vmatpush.bf16.msra.mxu3 %v2537_v9  ;;  %2895 = vmatmul.msk.bf16.vlgmr.msra.gmra.mxu1 %vm956_vm0, %v3857_v48  ;;  %v3499_v9 = vld [vmem:[#allocation2 + $0x434] sm:$0xf0]  ;;  %v2729_v38 = vor.u32 %v3463_v28, %v2728_v25  ;;  %v2554_v56 = vld [vmem:[#allocation2 + $0x1b8] sm:$0xf0]  ;;  %v2397_v1 = vor.u32 %v3377_v51, %v2394_v54  ;;  %v3433_v51 = vld [vmem:[#allocation2 + $0x22c] sm:$0xf] }
  0x63   :  { %1117 = vmatpush.bf16.msrb.mxu0 %v2697_v11  ;;  %1130 = vmatpush.bf16.msrb.mxu1 %v2825_v15  ;;  %v3389_v11 = vld [vmem:[#allocation2 + $0xcc] sm:$0xf]  ;;  %v2617_v15 = vor.u32 %v3435_v7, %v2616_v5  ;;  %v2873_v16 = vor.u32 %v3499_v9, %v2872_v8  ;;  %v2810_v61 = vld [vmem:[#allocation2 + $0x3b8] sm:$0xf0]  ;;  %v2557_v2 = vor.u32 %v3417_v55, %v2554_v56 }
  0x64   :  { %1094 = vmatpush.bf16.msra.mxu2 %v2393_v18  ;;  %v3431_v18 = vld [vmem:[#allocation2 + $0x214] sm:$0xf0]  ;;  %v2445_v20 = vor.u32 %v3389_v11, %v2442_v12  ;;  %v2378_v5 = vld [vmem:[#allocation2 + $0x58] sm:$0xf0]  ;;  %v3477_v9 = vld [vmem:[#allocation2 + $0x38c] sm:$0xf] }
  0x65   :  { %v2538_v7 = vld [vmem:[#allocation2 + $0x198] sm:$0xf0]  ;;  %v3445_v11 = vld [vmem:[#allocation2 + $0x28c] sm:$0xf] }
  0x66   :  { %1107 = vmatpush.bf16.msra.mxu3 %v2521_v19  ;;  %v2856_v19 = vld [vmem:[#allocation2 + $0x408] sm:$0xf]  ;;  %v2666_v12 = vld [vmem:[#allocation2 + $0x298] sm:$0xf0]  ;;  %v3397_v56 = vld [vmem:[#allocation2 + $0x10c] sm:$0xf] }
  0x67   :  { %1118 = vmatpush.bf16.msrb.mxu0 %v2681_v23  ;;  %1131 = vmatpush.bf16.msrb.mxu1 %v2809_v29  ;;  %v2426_v23 = vld [vmem:[#allocation2 + $0xb8] sm:$0xf0]  ;;  %v3489_v29 = vld [vmem:[#allocation2 + $0x3ec] sm:$0xf]  ;;  %v2857_v32 = vor.u32 %v3495_v21, %v2856_v19 }
  0x68   :  { %1095 = vmatpush.bf16.msra.mxu2 %v2377_v30  ;;  %v2842_v30 = vld [vmem:[#allocation2 + $0x3f8] sm:$0xf0]  ;;  %v3473_v21 = vld [vmem:[#allocation2 + $0x36c] sm:$0xf] }
  0x69   :  { %v2845_v39 = vor.u32 %v3489_v29, %v2842_v30  ;;  %v2522_v19 = vld [vmem:[#allocation2 + $0x178] sm:$0xf0]  ;;  %v3405_v30 = vld [vmem:[#allocation2 + $0x14c] sm:$0xf] }
  0x6a   :  { %1108 = vmatpush.bf16.msra.mxu3 %v2505_v31  ;;  %v2601_v31 = vor.u32 %v3431_v18, %v2600_v17  ;;  %v2362_v17 = vld [vmem:[#allocation2 + $0x38] sm:$0xf0]  ;;  %v3409_v18 = vld [vmem:[#allocation2 + $0x16c] sm:$0xf] }
  0x6b   :  { %1119 = vmatpush.bf16.msrb.mxu0 %v2665_v35  ;;  %1132 = vmatpush.bf16.msrb.mxu1 %v2793_v41  ;;  %v2429_v35 = vor.u32 %v3385_v22, %v2426_v23  ;;  %v3421_v41 = vld [vmem:[#allocation2 + $0x1cc] sm:$0xf]  ;;  %v2778_v22 = vld [vmem:[#allocation2 + $0x378] sm:$0xf0]  ;;  %v2525_v26 = vor.u32 %v3409_v18, %v2522_v19  ;;  %v3516_v18 = vld [vmem:[#allocation5 + $0x60] sm:$0xff] }
  0x6c   :  { %1096 = vmatpush.bf16.msra.mxu2 %v2361_v43  ;;  %v2717_v43 = vor.u32 %v3457_v33, %v2714_v34  ;;  %v2573_v50 = vor.u32 %v3421_v41, %v2570_v42  ;;  %v3441_v23 = vld [vmem:[#allocation2 + $0x26c] sm:$0xf]  ;;  %v2346_v28 = vld [vmem:[#allocation2 + $0x18] sm:$0xf0]  ;;  %v2781_v29 = vor.u32 %v3473_v21, %v2778_v22 }
  0x6d   :  { %v2762_v34 = vld [vmem:[#allocation2 + $0x358] sm:$0xf0] }
  0x6e   :  { %1109 = vmatpush.bf16.msra.mxu3 %v2489_v44  ;;  %v3485_v44 = vld [vmem:[#allocation2 + $0x3cc] sm:$0xf]  ;;  %v3515_v22 = vld [vmem:[#allocation5 + $0x58] sm:$0xff] }
  0x6f   :  { %1120 = vmatpush.bf16.msrb.mxu0 %v2649_v49  ;;  %1133 = vmatpush.bf16.msrb.mxu1 %v2777_v57  ;;  %v2413_v49 = vor.u32 %v3381_v37, %v2410_v40  ;;  %v2829_v52 = vor.u32 %v3485_v44, %v2826_v45  ;;  %v2701_v57 = vor.u32 %v3453_v46, %v2698_v47  ;;  %v3437_v37 = vld [vmem:[#allocation2 + $0x24c] sm:$0xf]  ;;  %v2490_v44 = vld [vmem:[#allocation2 + $0x138] sm:$0xf0] }
  0x70   :  { %1097 = vmatpush.bf16.msra.mxu2 %v2345_v62  ;;  %v3449_v62 = vld [vmem:[#allocation2 + $0x2ac] sm:$0xf]  ;;  %v2746_v47 = vld [vmem:[#allocation2 + $0x338] sm:$0xf0] }
  0x71   :  { %v3465_v45 = vld [vmem:[#allocation2 + $0x32c] sm:$0xf] }
  0x72   :  { %1110 = vmatpush.bf16.msra.mxu3 %v2473_v0  ;;  %v2682_v0 = vld [vmem:[#allocation2 + $0x2b8] sm:$0xf0]  ;;  %v2749_v55 = vor.u32 %v3465_v45, %v2746_v47  ;;  %v3524_v45 = vld [vmem:[#allocation5 + $0xa0] sm:$0xff] }
  0x73   :  { %1121 = vmatpush.bf16.msrb.mxu0 %v2633_v3  ;;  %1134 = vmatpush.bf16.msrb.mxu1 %v2761_v10  ;;  %v3373_v3 = vld [vmem:[#allocation2 + $0x4c] sm:$0xf]  ;;  %v2685_v8 = vor.u32 %v3449_v62, %v2682_v0  ;;  %v2794_v10 = vld [vmem:[#allocation2 + $0x398] sm:$0xf0] }
  0x74   :  { %1147 = vmatpush.bf16.msrb.mxu2 %v2889_v4  ;;  %v2813_v4 = vor.u32 %v3481_v58, %v2810_v61  ;;  %v2381_v13 = vor.u32 %v3373_v3, %v2378_v5  ;;  %v3461_v58 = vld [vmem:[#allocation2 + $0x30c] sm:$0xf]  ;;  %v2730_v0 = vld [vmem:[#allocation2 + $0x318] sm:$0xf0] }
  0x75   :  { %1098 = vmatmul.bf16.vlgmr.msra.gmra.mxu2 %v3842_v53  ;;  %1111 = vmatmul.bf16.vlgmr.msra.gmra.mxu3 %v3848_v63  ;;  %v3429_v3 = vld [vmem:[#allocation2 + $0x20c] sm:$0xf] }
  0x76   :  { %1155 = vmatpush.bf16.msrb.mxu3 %v2461_v6  ;;  %v3413_v6 = vld [vmem:[#allocation2 + $0x18c] sm:$0xf] }
  0x77   :  { %1122 = vmatpush.bf16.msrb.mxu0 %v2617_v15  ;;  %1135 = vmatpush.bf16.msrb.mxu1 %v2745_v24  ;;  %v2541_v14 = vor.u32 %v3413_v6, %v2538_v7  ;;  %v3369_v15 = vld [vmem:[#allocation2 + $0x2c] sm:$0xf]  ;;  %v2650_v24 = vld [vmem:[#allocation2 + $0x278] sm:$0xf0]  ;;  %v2733_v6 = vor.u32 %v3461_v58, %v2730_v0 }
  0x78   :  { %1148 = vmatpush.bf16.msrb.mxu2 %v2873_v16  ;;  %v2797_v16 = vor.u32 %v3477_v9, %v2794_v10  ;;  %v2365_v25 = vor.u32 %v3369_v15, %v2362_v17  ;;  %v2653_v33 = vor.u32 %v3441_v23, %v2650_v24  ;;  %v3511_v9 = vld [vmem:[#allocation5 + $0x38] sm:$0xff]  ;;  %v3510_v10 = vld [vmem:[#allocation5 + $0x30] sm:$0xff]  ;;  %v3505_v15 = vld [vmem:[#allocation5 + $0x8] sm:$0xff] }
  0x7a   :  { %1156 = vmatpush.bf16.msrb.mxu3 %v2445_v20  ;;  %v2669_v20 = vor.u32 %v3445_v11, %v2666_v12  ;;  %v3508_v11 = vld [vmem:[#allocation5 + $0x20] sm:$0xff]  ;;  %v3507_v12 = vld [vmem:[#allocation5 + $0x18] sm:$0xff] }
  0x7b   :  { %1123 = vmatpush.bf16.msrb.mxu0 %v2601_v31  ;;  %1136 = vmatpush.bf16.msrb.mxu1 %v2729_v38  ;;  %v2506_v31 = vld [vmem:[#allocation2 + $0x158] sm:$0xf0] }
  0x7c   :  { %1149 = vmatpush.bf16.msrb.mxu2 %v2857_v32  ;;  %v3469_v32 = vld [vmem:[#allocation2 + $0x34c] sm:$0xf]  ;;  %v2634_v38 = vld [vmem:[#allocation2 + $0x258] sm:$0xf0]  ;;  %v2509_v40 = vor.u32 %v3405_v30, %v2506_v31 }
  0x7d   :  { %v2765_v41 = vor.u32 %v3469_v32, %v2762_v34  ;;  %v2637_v46 = vor.u32 %v3437_v37, %v2634_v38  ;;  %v3513_v30 = vld [vmem:[#allocation5 + $0x48] sm:$0xff]  ;;  %v3527_v38 = vld [vmem:[#allocation5 + $0xb8] sm:$0xff] }
  0x7e   :  { %1157 = vmatpush.bf16.msrb.mxu3 %v2429_v35  ;;  %1124 = vmatmul.bf16.vlgmr.msrb.gmra.mxu0 %v3844_v59  ;;  %v3501_v35 = vld [vmem:[#allocation2 + $0x44c] sm:$0xf] }
  0x7f   :  { %1168 = vmatpush.bf16.msra.mxu0 %v2589_v36  ;;  %1181 = vmatpush.bf16.msra.mxu1 %v2717_v43  ;;  %v2890_v36 = vld [vmem:[#allocation2 + $0x458] sm:$0xf0]  ;;  %v3401_v43 = vld [vmem:[#allocation2 + $0x12c] sm:$0xf] }
  0x80   :  { %1194 = vmatpush.bf16.msra.mxu2 %v2845_v39  ;;  %1137 = vmatmul.bf16.vlgmr.msrb.gmra.mxu1 %v3846_v60  ;;  %v2349_v39 = vor.u32 %v3365_v27, %v2346_v28  ;;  %v2893_v42 = vor.u32 %v3501_v35, %v2890_v36  ;;  %v2493_v54 = vor.u32 %v3401_v43, %v2490_v44  ;;  %v3512_v35 = vld [vmem:[#allocation5 + $0x40] sm:$0xff]  ;;  %v3525_v44 = vld [vmem:[#allocation5 + $0xa8] sm:$0xff] }
  0x82   :  { %1158 = vmatpush.bf16.msrb.mxu3 %v2413_v49  ;;  %v3497_v49 = vld [vmem:[#allocation2 + $0x42c] sm:$0xf] }
  0x83   :  { %1169 = vmatpush.bf16.msra.mxu0 %v2573_v50  ;;  %1182 = vmatpush.bf16.msra.mxu1 %v2701_v57  ;;  %v2874_v50 = vld [vmem:[#allocation2 + $0x438] sm:$0xf0] }
  0x84   :  { %1195 = vmatpush.bf16.msra.mxu2 %v2829_v52  ;;  %v2618_v52 = vld [vmem:[#allocation2 + $0x238] sm:$0xf0]  ;;  %v2877_v61 = vor.u32 %v3497_v49, %v2874_v50 }
  0x85   :  { %2896 = vmatmul.msk.bf16.vlgmr.msrb.gmra.mxu2 %vm956_vm0, %v3857_v48  ;;  %v2474_v57 = vld [vmem:[#allocation2 + $0x118] sm:$0xf0]  ;;  %v2621_v62 = vor.u32 %v3433_v51, %v2618_v52 }
  0x86   :  { %1159 = vmatpush.bf16.msrb.mxu3 %v2397_v1  ;;  %v3493_v1 = vld [vmem:[#allocation2 + $0x40c] sm:$0xf]  ;;  %v2477_v5 = vor.u32 %v3397_v56, %v2474_v57 }
  0x87   :  { %1170 = vmatpush.bf16.msra.mxu0 %v2557_v2  ;;  %1183 = vmatpush.bf16.msra.mxu1 %v2685_v8  ;;  %v2858_v2 = vld [vmem:[#allocation2 + $0x418] sm:$0xf0] }
  0x88   :  { %1196 = vmatpush.bf16.msra.mxu2 %v2813_v4  ;;  %v2602_v4 = vld [vmem:[#allocation2 + $0x218] sm:$0xf0]  ;;  %v2861_v7 = vor.u32 %v3493_v1, %v2858_v2  ;;  %v3521_v1 = vld [vmem:[#allocation5 + $0x88] sm:$0xff] }
  0x89   :  { %v2605_v8 = vor.u32 %v3429_v3, %v2602_v4  ;;  %v3520_v4 = vld [vmem:[#allocation5 + $0x80] sm:$0xff] }
  0x8a   :  { %1160 = vmatpush.bf16.msrb.mxu3 %v2381_v13  ;;  %v3506_v13 = vld [vmem:[#allocation5 + $0x10] sm:$0xff] }
  0x8b   :  { %1171 = vmatpush.bf16.msra.mxu0 %v2541_v14  ;;  %1184 = vmatpush.bf16.msra.mxu1 %v2669_v20  ;;  %v3519_v14 = vld [vmem:[#allocation5 + $0x78] sm:$0xff] }
  0x8c   :  { %1197 = vmatpush.bf16.msra.mxu2 %v2797_v16 }
  0x8e   :  { %1161 = vmatpush.bf16.msrb.mxu3 %v2365_v25 }
  0x8f   :  { %1172 = vmatpush.bf16.msra.mxu0 %v2525_v26  ;;  %1185 = vmatpush.bf16.msra.mxu1 %v2653_v33  ;;  %v3514_v26 = vld [vmem:[#allocation5 + $0x50] sm:$0xff] }
  0x90   :  { %1198 = vmatpush.bf16.msra.mxu2 %v2781_v29 }
  0x92   :  { %1162 = vmatpush.bf16.msrb.mxu3 %v2349_v39  ;;  %v3526_v39 = vld [vmem:[#allocation5 + $0xb0] sm:$0xff] }
  0x93   :  { %1173 = vmatpush.bf16.msra.mxu0 %v2509_v40  ;;  %1186 = vmatpush.bf16.msra.mxu1 %v2637_v46 }
  0x94   :  { %1199 = vmatpush.bf16.msra.mxu2 %v2765_v41 }
  0x95   :  { %1163 = vmatmul.bf16.vlgmr.msrb.gmra.mxu3 %v3842_v53  ;;  %v3509_v53 = vld [vmem:[#allocation5 + $0x28] sm:$0xff] }
  0x96   :  { %1212 = vmatpush.bf16.msra.mxu3 %v2893_v42 }
  0x97   :  { %1174 = vmatpush.bf16.msra.mxu0 %v2493_v54  ;;  %1187 = vmatpush.bf16.msra.mxu1 %v2621_v62  ;;  %v3523_v54 = vld [vmem:[#allocation5 + $0x98] sm:$0xff] }
  0x98   :  { %1200 = vmatpush.bf16.msra.mxu2 %v2749_v55  ;;  %v3522_v55 = vld [vmem:[#allocation5 + $0x90] sm:$0xff] }
  0x9a   :  { %1213 = vmatpush.bf16.msra.mxu3 %v2877_v61 }
  0x9b   :  { %1175 = vmatpush.bf16.msra.mxu0 %v2477_v5  ;;  %1188 = vmatpush.bf16.msra.mxu1 %v2605_v8  ;;  %v3535_v5 = vld [vmem:[#allocation5 + $0xf8] sm:$0xff]  ;;  %v3533_v8 = vld [vmem:[#allocation5 + $0xe8] sm:$0xff] }
  0x9c   :  { %1201 = vmatpush.bf16.msra.mxu2 %v2733_v6 }
  0x9e   :  { %1214 = vmatpush.bf16.msra.mxu3 %v2861_v7  ;;  %1176 = vmatmul.bf16.vlgmr.msra.gmra.mxu0 %v3848_v63  ;;  %v3518_v63 = vld [vmem:[#allocation5 + $0x70] sm:$0xff] }
  0x9f   :  { %1488 = vmatpush.bf16.msrb.mxu0 %v3511_v9  ;;  %1202 = vmatmul.bf16.vlgmr.msra.gmra.mxu2 %v3846_v60  ;;  %v3504_v60 = vld [vmem:[#allocation5] sm:$0xff]  ;;  %v3534_v7 = vld [vmem:[#allocation5 + $0xf0] sm:$0xff] }
  0xa0   :  { %1189 = vmatmul.bf16.vlgmr.msra.gmra.mxu1 %v3844_v59  ;;  %v3882_v59 = vld [vmem:[%s3961_s3] sm:$0xf]  ;;  %1514 = vmatpush.bf16.msrb.mxu2 %v3527_v38 }
  0xa1   :  { %1501 = vmatpush.bf16.msrb.mxu1 %v3519_v14  ;;  %v231_v16 = vperm.slane %v3882_v59, 0  ;;  %v232_v41 = vperm.slane %v3882_v59, 1  ;;  %v233_v9 = vperm.slane %v3882_v59, 2  ;;  %v3531_v14 = vld [vmem:[#allocation5 + $0xd8] sm:$0xff] }
  0xa2   :  { %1527 = vmatpush.bf16.msrb.mxu3 %v3535_v5 }
  0xa3   :  { %1489 = vmatpush.bf16.msrb.mxu0 %v3510_v10 }
  0xa4   :  { %1515 = vmatpush.bf16.msrb.mxu2 %v3526_v39 }
  0xa5   :  { %2897 = vmatmul.msk.bf16.vlgmr.msra.gmra.mxu3 %vm956_vm0, %v3857_v48  ;;  %1502 = vmatpush.bf16.msrb.mxu1 %v3518_v63  ;;  %v3517_v48 = vld [vmem:[#allocation5 + $0x68] sm:$0xff] }
  0xa6   :  { %1528 = vmatpush.bf16.msrb.mxu3 %v3534_v7 }
  0xa7   :  { %1490 = vmatpush.bf16.msrb.mxu0 %v3509_v53  ;;  %v3532_v53 = vld [vmem:[#allocation5 + $0xe0] sm:$0xff] }
  0xa8   :  { %1516 = vmatpush.bf16.msrb.mxu2 %v3525_v44 }
  0xa9   :  { %1503 = vmatpush.bf16.msrb.mxu1 %v3517_v48 }
  0xaa   :  { %1529 = vmatpush.bf16.msrb.mxu3 %v3533_v8 }
  0xab   :  { %1491 = vmatpush.bf16.msrb.mxu0 %v3508_v11 }
  0xac   :  { %1517 = vmatpush.bf16.msrb.mxu2 %v3524_v45 }
  0xad   :  { %1504 = vmatpush.bf16.msrb.mxu1 %v3516_v18 }
  0xae   :  { %1530 = vmatpush.bf16.msrb.mxu3 %v3532_v53 }
  0xaf   :  { %1492 = vmatpush.bf16.msrb.mxu0 %v3507_v12 }
  0xb0   :  { %1518 = vmatpush.bf16.msrb.mxu2 %v3523_v54 }
  0xb1   :  { %v969_v17 = vpop.f32.mrf.mxu0  ;;  %1505 = vmatpush.bf16.msrb.mxu1 %v3515_v22  ;;  %v3528_v22 = vld [vmem:[#allocation5 + $0xc0] sm:$0xff] }
  0xb2   :  { %v970_v19 = vadd.f32 %v969_v17, %v231_v16  ;;  %1531 = vmatpush.bf16.msrb.mxu3 %v3531_v14  ;;  %v3530_v16 = vld [vmem:[#allocation5 + $0xd0] sm:$0xff]  ;;  %v3186_v14 = vld [vmem:[#allocation7 + $0x118] sm:$0xf] }
  0xb3   :  { %1493 = vmatpush.bf16.msrb.mxu0 %v3506_v13  ;;  %v982_v20 = vpop.f32.mrf.mxu1 }
  0xb4   :  { %v983_v21 = vadd.f32 %v982_v20, %v970_v19  ;;  %1519 = vmatpush.bf16.msrb.mxu2 %v3522_v55  ;;  %v3529_v19 = vld [vmem:[#allocation5 + $0xc8] sm:$0xff] }
  0xb5   :  { %1506 = vmatpush.bf16.msrb.mxu1 %v3514_v26 }
  0xb6   :  { %1532 = vmatpush.bf16.msrb.mxu3 %v3530_v16  ;;  %v3617_v16 = vld [vmem:[#allocation7 + $0x268] sm:$0xf0] }
  0xb7   :  { %1494 = vmatpush.bf16.msrb.mxu0 %v3505_v15 }
  0xb8   :  { %v995_v23 = vpop.f32.mrf.mxu2  ;;  %v1008_v24 = vpop.f32.mrf.mxu3  ;;  %1520 = vmatpush.bf16.msrb.mxu2 %v3521_v1  ;;  %v3537_v1 = vld [vmem:[%s3964_s6 + $0x4] sm:$0xf0] }
  0xb9   :  { %v971_v25 = vpop.f32.mrf.mxu0  ;;  %v996_v27 = vadd.f32 %v995_v23, %v983_v21  ;;  %1507 = vmatpush.bf16.msrb.mxu1 %v3513_v30 }
  0xba   :  { %1533 = vmatpush.bf16.msrb.mxu3 %v3529_v19  ;;  %v3326_v19 = vld [vmem:[#allocation7 + $0x230] sm:$0xf] }
  0xbb   :  { %1495 = vmatpush.bf16.msrb.mxu0 %v3504_v60  ;;  %v984_v28 = vpop.f32.mrf.mxu1  ;;  %v1009_v29 = vadd.f32 %v1008_v24, %v996_v27 }
  0xbc   :  { %1521 = vmatpush.bf16.msrb.mxu2 %v3520_v4 }
  0xbd   :  { %1508 = vmatpush.bf16.msrb.mxu1 %v3512_v35 }
  0xbe   :  { %1534 = vmatpush.bf16.msrb.mxu3 %v3528_v22 }
  0xc0   :  { %v997_v31 = vpop.f32.mrf.mxu2  ;;  %v1010_v32 = vpop.f32.mrf.mxu3 }
  0xc1   :  { %v1021_v33 = vpop.f32.mrf.mxu0 }
  0xc2   :  { %v1022_v34 = vadd.f32 %v1021_v33, %v1009_v29  ;;  %v234_v29 = vperm.slane %v3882_v59, 3  ;;  %v3631_v59 = vld [vmem:[%s3963_s5] ss:$0 sm:$0xff] }
  0xc4   :  { %v1220_v36 = vmax.f32 %v1022_v34, 0.0 }
  0xc6   :  { %v1224_v37 = vpack.c.bf16 %v1220_v36, %v1220_v36 }
  0xc8   :  { %1496 = vmatmul.bf16.vlgmr.msrb.gmra.mxu0 %v1224_v37 }
  0xc9   :  { %v1023_v40 = vpop.f32.mrf.mxu0 }
  0xcf   :  { %v1034_v42 = vpop.f32.mrf.mxu1 }
  0xd0   :  { %v1035_v43 = vadd.f32 %v1034_v42, %v232_v41 }
  0xd7   :  { %v1036_v50 = vpop.f32.mrf.mxu1 }
  0xd8   :  { %v1047_v46 = vpop.f32.mrf.mxu2  ;;  %v1060_v49 = vpop.f32.mrf.mxu3 }
  0xd9   :  { %v1048_v47 = vadd.f32 %v1047_v46, %v1035_v43 }
  0xdb   :  { %v1073_v51 = vpop.f32.mrf.mxu0  ;;  %v1061_v52 = vadd.f32 %v1060_v49, %v1048_v47 }
  0xdd   :  { %v1074_v56 = vadd.f32 %v1073_v51, %v1061_v52 }
  0xdf   :  { %v1086_v61 = vpop.f32.mrf.mxu1 }
  0xe0   :  { %v1049_v57 = vpop.f32.mrf.mxu2  ;;  %v1062_v58 = vpop.f32.mrf.mxu3  ;;  %v1087_v0 = vadd.f32 %v1086_v61, %v1074_v56  ;;  %v3036_v56 = vld [vmem:[%s3964_s6 + $0x10] sm:$0xf] }
  0xe1   :  { %v3539_v57 = vld [vmem:[%s3964_s6 + $0x14] sm:$0xf0]  ;;  %v3538_v58 = vld [vmem:[%s3964_s6 + $0x14] sm:$0xf] }
  0xe2   :  { %v1221_v2 = vmax.f32 %v1087_v0, 0.0  ;;  %v3037_v61 = vor.u32 %v3539_v57, %v3036_v56  ;;  %v3028_v0 = vld [vmem:[%s3964_s6] sm:$0xf]  ;;  %v3597_v56 = vld [vmem:[#allocation7 + $0x1c8] sm:$0xf0] }
  0xe3   :  { %v1075_v62 = vpop.f32.mrf.mxu0 }
  0xe4   :  { %v1225_v3 = vpack.c.bf16 %v1221_v2, %v1221_v2  ;;  %v3038_v62 = vld [vmem:[%s3964_s6 + $0x18] sm:$0xf0]  ;;  %1593 = vmatpush.bf16.msra.mxu0 %v3037_v61  ;;  %v3128_v61 = vld [vmem:[#allocation7 + $0xb4] sm:$0xf0] }
  0xe5   :  { %v3041_v2 = vor.u32 %v3538_v58, %v3038_v62  ;;  %v3560_v58 = vld [vmem:[#allocation7 + $0xa4] sm:$0xf] }
  0xe6   :  { %1509 = vmatmul.bf16.vlgmr.msrb.gmra.mxu1 %v1225_v3  ;;  %v3029_v3 = vor.u32 %v3537_v1, %v3028_v0  ;;  %v3600_v62 = vld [vmem:[#allocation7 + $0x1e4] sm:$0xf]  ;;  %v3288_v0 = vld [vmem:[#allocation7 + $0x1f4] sm:$0xf0] }
  0xe7   :  { %v1088_v6 = vpop.f32.mrf.mxu1  ;;  %1606 = vmatpush.bf16.msra.mxu1 %v3041_v2 }
  0xe8   :  { %1594 = vmatpush.bf16.msra.mxu0 %v3029_v3  ;;  %v3086_v3 = vld [vmem:[#allocation7 + $0x50] sm:$0xf] }
  0xf8   :  { %v1099_v10 = vpop.f32.mrf.mxu2  ;;  %v1112_v11 = vpop.f32.mrf.mxu3 }
  0xf9   :  { %v1100_v12 = vadd.f32 %v1099_v10, %v233_v9 }
  0xfb   :  { %v1125_v13 = vpop.f32.mrf.mxu0  ;;  %v1113_v15 = vadd.f32 %v1112_v11, %v1100_v12  ;;  %v3536_v11 = vld [vmem:[%s3964_s6 + $0x4] sm:$0xf]  ;;  %v3030_v12 = vld [vmem:[%s3964_s6 + $0x8] sm:$0xf0] }
  0xfd   :  { %v1138_v63 = vpop.f32.mrf.mxu1  ;;  %v1126_v17 = vadd.f32 %v1125_v13, %v1113_v15  ;;  %v3033_v13 = vor.u32 %v3536_v11, %v3030_v12  ;;  %v3577_v15 = vld [vmem:[#allocation7 + $0x128] sm:$0xf0]  ;;  %v3595_v11 = vld [vmem:[#allocation7 + $0x1bc] sm:$0xf]  ;;  %v3268_v12 = vld [vmem:[#allocation7 + $0x1cc] sm:$0xf0] }
  0xff   :  { %v1139_v20 = vadd.f32 %v1138_v63, %v1126_v17  ;;  %1607 = vmatpush.bf16.msra.mxu1 %v3033_v13  ;;  %v3346_v63 = vld [vmem:[#allocation7 + $0x258] sm:$0xf]  ;;  %v3572_v17 = vld [vmem:[#allocation7 + $0x100] sm:$0xf0] }
 0x100   :  { %v1101_v60 = vpop.f32.mrf.mxu2  ;;  %v1114_v48 = vpop.f32.mrf.mxu3 }
 0x101   :  { %v3187_v60 = vor.u32 %v3577_v15, %v3186_v14  ;;  %v3166_v48 = vld [vmem:[#allocation7 + $0xf0] sm:$0xf]  ;;  %v3066_v15 = vld [vmem:[#allocation7 + $0x28] sm:$0xf] }
 0x103   :  { %v1127_v18 = vpop.f32.mrf.mxu0  ;;  %2141 = vmatpush.bf16.msra.mxu2 %v3187_v60  ;;  %v3226_v60 = vld [vmem:[#allocation7 + $0x168] sm:$0xf] }
 0x104   :  { %v3347_v18 = vor.u32 %v3617_v16, %v3346_v63  ;;  %v3547_v63 = vld [vmem:[#allocation7 + $0x38] sm:$0xf0] }
 0x105   :  { %v1140_v21 = vpop.f32.mrf.mxu1 }
 0x106   :  { %v3167_v21 = vor.u32 %v3572_v17, %v3166_v48  ;;  %2154 = vmatpush.bf16.msra.mxu3 %v3347_v18  ;;  %v3587_v48 = vld [vmem:[#allocation7 + $0x178] sm:$0xf0]  ;;  %v3271_v17 = vor.u32 %v3595_v11, %v3268_v12  ;;  %v3550_v18 = vld [vmem:[#allocation7 + $0x54] sm:$0xf]  ;;  %v3176_v11 = vld [vmem:[#allocation7 + $0x10c] sm:$0xf0] }
 0x108   :  { %v1151_v23 = vpop.f32.mrf.mxu2  ;;  %2142 = vmatpush.bf16.msra.mxu2 %v3167_v21  ;;  %v3248_v21 = vld [vmem:[#allocation7 + $0x1a4] sm:$0xf0] }
 0x109   :  { %v1152_v24 = vadd.f32 %v1151_v23, %v1139_v20  ;;  %v3612_v20 = vld [vmem:[#allocation7 + $0x240] sm:$0xf0]  ;;  %v3146_v23 = vld [vmem:[#allocation7 + $0xc8] sm:$0xf] }
 0x10a   :  { %v3327_v22 = vor.u32 %v3612_v20, %v3326_v19  ;;  %v3088_v19 = vld [vmem:[#allocation7 + $0x64] sm:$0xf0]  ;;  %v3590_v20 = vld [vmem:[#allocation7 + $0x194] sm:$0xf] }
 0x10b   :  { %v1222_v25 = vmax.f32 %v1152_v24, 0.0  ;;  %v3567_v24 = vld [vmem:[#allocation7 + $0xd8] sm:$0xf0] }
 0x10c   :  { %2155 = vmatpush.bf16.msra.mxu3 %v3327_v22  ;;  %v1542_v22 = vld [vmem:[%s3959_s1] sm:$0xff] }
 0x10d   :  { %v1226_v26 = vpack.c.bf16 %v1222_v25, %v1222_v25  ;;  %v3306_v25 = vld [vmem:[#allocation7 + $0x208] sm:$0xf] }
 0x10f   :  { %1522 = vmatmul.bf16.vlgmr.msrb.gmra.mxu2 %v1226_v26  ;;  %v3607_v26 = vld [vmem:[#allocation7 + $0x218] sm:$0xf0] }
 0x110   :  { %v1153_v27 = vpop.f32.mrf.mxu2 }
 0x111   :  { %v3575_v27 = vld [vmem:[#allocation7 + $0x11c] sm:$0xf] }
 0x118   :  { %v1164_v28 = vpop.f32.mrf.mxu3 }
 0x119   :  { %v1165_v32 = vadd.f32 %v1164_v28, %v234_v29  ;;  %v3188_v28 = vld [vmem:[#allocation7 + $0x12c] sm:$0xf0] }
 0x11a   :  { %v3191_v29 = vor.u32 %v3575_v27, %v3188_v28  ;;  %v3091_v27 = vor.u32 %v3550_v18, %v3088_v19 }
 0x11b   :  { %v1177_v30 = vpop.f32.mrf.mxu0 }
 0x11c   :  { %v1178_v34 = vadd.f32 %v1177_v30, %v1165_v32  ;;  %v3615_v30 = vld [vmem:[#allocation7 + $0x25c] sm:$0xf]  ;;  %v3147_v32 = vor.u32 %v3567_v24, %v3146_v23  ;;  %2167 = vmatpush.bf16.msrb.mxu0 %v3191_v29  ;;  %v3067_v23 = vor.u32 %v3547_v63, %v3066_v15  ;;  %v3227_v24 = vor.u32 %v3587_v48, %v3226_v60  ;;  %v3206_v29 = vld [vmem:[#allocation7 + $0x140] sm:$0xf]  ;;  %v3134_v63 = vld [vmem:[#allocation7 + $0xa8] sm:$0xf] }
 0x11d   :  { %v1190_v31 = vpop.f32.mrf.mxu1  ;;  %v3563_v60 = vld [vmem:[#allocation7 + $0xb8] sm:$0xf0] }
 0x11e   :  { %v1191_v38 = vadd.f32 %v1190_v31, %v1178_v34  ;;  %v3348_v31 = vld [vmem:[#allocation7 + $0x26c] sm:$0xf0]  ;;  %v3562_v34 = vld [vmem:[#allocation7 + $0xb0] sm:$0xf0]  ;;  %2143 = vmatpush.bf16.msra.mxu2 %v3147_v32  ;;  %v3603_v48 = vld [vmem:[#allocation7 + $0x1f8] sm:$0xf0]  ;;  %v3135_v19 = vor.u32 %v3563_v60, %v3134_v63 }
 0x11f   :  { %v3581_v63 = vld [vmem:[#allocation7 + $0x14c] sm:$0xf] }
 0x120   :  { %v1166_v33 = vpop.f32.mrf.mxu3 }
 0x121   :  { %v3126_v33 = vld [vmem:[#allocation7 + $0xa0] sm:$0xf] }
 0x122   :  { %v1203_v35 = vpop.f32.mrf.mxu2 }
 0x123   :  { %v1179_v36 = vpop.f32.mrf.mxu0  ;;  %v1204_v39 = vadd.f32 %v1203_v35, %v1191_v38  ;;  %v3351_v35 = vor.u32 %v3615_v30, %v3348_v31  ;;  %v3168_v38 = vld [vmem:[#allocation7 + $0x104] sm:$0xf0]  ;;  %v3582_v30 = vld [vmem:[#allocation7 + $0x150] sm:$0xf0]  ;;  %v3251_v31 = vor.u32 %v3590_v20, %v3248_v21  ;;  %v3114_v21 = vld [vmem:[#allocation7 + $0x80] sm:$0xf] }
 0x124   :  { %v3307_v36 = vor.u32 %v3607_v26, %v3306_v25  ;;  %v3046_v25 = vld [vmem:[#allocation7] sm:$0xf]  ;;  %v3542_v26 = vld [vmem:[#allocation7 + $0x10] sm:$0xf0] }
 0x125   :  { %v1192_v37 = vpop.f32.mrf.mxu1  ;;  %2180 = vmatpush.bf16.msrb.mxu1 %v3351_v35  ;;  %v3354_v35 = vld [vmem:[#allocation7 + $0x260] sm:$0xf] }
 0x126   :  { %v3570_v37 = vld [vmem:[#allocation7 + $0xf4] sm:$0xf]  ;;  %2156 = vmatpush.bf16.msra.mxu3 %v3307_v36  ;;  %v3047_v36 = vor.u32 %v3542_v26, %v3046_v25 }
 0x128   :  { %v1216_v40 = vpop.f32.mrf.mxu3 }
 0x129   :  { %v1217_v41 = vadd.f32 %v1216_v40, %v1204_v39  ;;  %v3610_v39 = vld [vmem:[#allocation7 + $0x234] sm:$0xf]  ;;  %v3286_v40 = vld [vmem:[#allocation7 + $0x1e0] sm:$0xf] }
 0x12a   :  { %v1205_v42 = vpop.f32.mrf.mxu2 }
 0x12b   :  { %v1223_v43 = vmax.f32 %v1217_v41, 0.0  ;;  %v3602_v41 = vld [vmem:[#allocation7 + $0x1f0] sm:$0xf0]  ;;  %v3171_v42 = vor.u32 %v3570_v37, %v3168_v38  ;;  %v3545_v38 = vld [vmem:[#allocation7 + $0x2c] sm:$0xf] }
 0x12c   :  { %v3618_v37 = vld [vmem:[#allocation7 + $0x270] sm:$0xf0] }
 0x12d   :  { %v1227_v44 = vpack.c.bf16 %v1223_v43, %v1223_v43  ;;  %v3328_v43 = vld [vmem:[#allocation7 + $0x244] sm:$0xf0]  ;;  %2168 = vmatpush.bf16.msrb.mxu0 %v3171_v42  ;;  %v3228_v42 = vld [vmem:[#allocation7 + $0x17c] sm:$0xf0] }
 0x12f   :  { %1535 = vmatmul.bf16.vlgmr.msrb.gmra.mxu3 %v1227_v44  ;;  %v3331_v44 = vor.u32 %v3610_v39, %v3328_v43  ;;  %v3068_v39 = vld [vmem:[#allocation7 + $0x3c] sm:$0xf0]  ;;  %v3207_v43 = vor.u32 %v3582_v30, %v3206_v29  ;;  %v3254_v29 = vld [vmem:[#allocation7 + $0x198] sm:$0xf]  ;;  %v3593_v30 = vld [vmem:[#allocation7 + $0x1a8] sm:$0xf0] }
 0x130   :  { %v1218_v45 = vpop.f32.mrf.mxu3 }
 0x131   :  { %v3565_v45 = vld [vmem:[#allocation7 + $0xcc] sm:$0xf]  ;;  %2181 = vmatpush.bf16.msrb.mxu1 %v3331_v44 }
 0x145   :  { %v1497_v46 = vpop.f32.mrf.mxu0 }
 0x146   :  { %v1498_v49 = vadd.f32 %v3631_v59, %v1497_v46  ;;  %v3127_v46 = vor.u32 %v3562_v34, %v3126_v33  ;;  %v3605_v59 = vld [vmem:[#allocation7 + $0x20c] sm:$0xf]  ;;  %v3194_v33 = vld [vmem:[#allocation7 + $0x120] sm:$0xf]  ;;  %v3578_v34 = vld [vmem:[#allocation7 + $0x130] sm:$0xf0] }
 0x147   :  { %v3195_v44 = vor.u32 %v3578_v34, %v3194_v33  ;;  %v3566_v33 = vld [vmem:[#allocation7 + $0xd4] sm:$0xf]  ;;  %v3156_v34 = vld [vmem:[#allocation7 + $0xe4] sm:$0xf0] }
 0x148   :  { %2144 = vmatpush.bf16.msra.mxu2 %v3127_v46 }
 0x14d   :  { %v1499_v47 = vpop.f32.mrf.mxu0 }
 0x14e   :  { %v3148_v47 = vld [vmem:[#allocation7 + $0xdc] sm:$0xf0] }
 0x163   :  { %v1510_v50 = vpop.f32.mrf.mxu1 }
 0x164   :  { %v1511_v51 = vadd.f32 %v1510_v50, %v1498_v49  ;;  %v3308_v49 = vld [vmem:[#allocation7 + $0x21c] sm:$0xf0]  ;;  %v3287_v50 = vor.u32 %v3602_v41, %v3286_v40  ;;  %v3585_v41 = vld [vmem:[#allocation7 + $0x16c] sm:$0xf] }
 0x165   :  { %v3311_v57 = vor.u32 %v3605_v59, %v3308_v49  ;;  %v3573_v59 = vld [vmem:[#allocation7 + $0x108] sm:$0xf0]  ;;  %v3334_v49 = vld [vmem:[#allocation7 + $0x238] sm:$0xf] }
 0x166   :  { %2157 = vmatpush.bf16.msra.mxu3 %v3287_v50  ;;  %v3613_v50 = vld [vmem:[#allocation7 + $0x248] sm:$0xf0] }
 0x167   :  { %2182 = vmatpush.bf16.msrb.mxu1 %v3311_v57  ;;  %v3576_v57 = vld [vmem:[#allocation7 + $0x124] sm:$0xf] }
 0x16b   :  { %v1512_v52 = vpop.f32.mrf.mxu1 }
 0x16c   :  { %v3557_v52 = vld [vmem:[#allocation7 + $0x88] sm:$0xf0] }
 0x192   :  { %v1523_v54 = vpop.f32.mrf.mxu2 }
 0x193   :  { %v1524_v4 = vadd.f32 %v1523_v54, %v1511_v51  ;;  %v3106_v51 = vld [vmem:[#allocation7 + $0x78] sm:$0xf] }
 0x194   :  { %v3266_v54 = vld [vmem:[#allocation7 + $0x1b8] sm:$0xf]  ;;  %v3107_v1 = vor.u32 %v3557_v52, %v3106_v51  ;;  %v3071_v51 = vor.u32 %v3545_v38, %v3068_v39  ;;  %v3231_v52 = vor.u32 %v3585_v41, %v3228_v42  ;;  %v3074_v39 = vld [vmem:[#allocation7 + $0x30] sm:$0xf] }
 0x195   :  { %v3267_v2 = vor.u32 %v3597_v56, %v3266_v54  ;;  %v3540_v54 = vld [vmem:[#allocation7 + $0x4] sm:$0xf]  ;;  %v3208_v56 = vld [vmem:[#allocation7 + $0x154] sm:$0xf0]  ;;  %v3234_v41 = vld [vmem:[#allocation7 + $0x170] sm:$0xf] }
 0x196   :  { %2145 = vmatpush.bf16.msra.mxu2 %v3107_v1  ;;  %v3335_v1 = vor.u32 %v3613_v50, %v3334_v49  ;;  %v3296_v49 = vld [vmem:[#allocation7 + $0x1fc] sm:$0xf0] }
 0x197   :  { %2158 = vmatpush.bf16.msra.mxu3 %v3267_v2  ;;  %v3154_v2 = vld [vmem:[#allocation7 + $0xd0] sm:$0xf] }
 0x19a   :  { %v1525_v55 = vpop.f32.mrf.mxu2 }
 0x19b   :  { %v3151_v55 = vor.u32 %v3565_v45, %v3148_v47  ;;  %v3174_v45 = vld [vmem:[#allocation7 + $0xf8] sm:$0xf]  ;;  %v3355_v47 = vor.u32 %v3618_v37, %v3354_v35  ;;  %v3606_v35 = vld [vmem:[#allocation7 + $0x214] sm:$0xf]  ;;  %v3316_v37 = vld [vmem:[#allocation7 + $0x224] sm:$0xf0] }
 0x19c   :  { %v3319_v38 = vor.u32 %v3606_v35, %v3316_v37  ;;  %v3574_v35 = vld [vmem:[#allocation7 + $0x110] sm:$0xf0] }
 0x19d   :  { %2169 = vmatpush.bf16.msrb.mxu0 %v3151_v55  ;;  %v3048_v55 = vld [vmem:[#allocation7 + $0x14] sm:$0xf0]  ;;  %v3614_v37 = vld [vmem:[#allocation7 + $0x250] sm:$0xf0] }
 0x1b2   :  { %v1536_v5 = vpop.f32.mrf.mxu3 }
 0x1b3   :  { %v1537_v6 = vadd.f32 %v1536_v5, %v1524_v4  ;;  %v3552_v4 = vld [vmem:[#allocation7 + $0x60] sm:$0xf0]  ;;  %v3246_v5 = vld [vmem:[#allocation7 + $0x190] sm:$0xf] }
 0x1b4   :  { %v3087_v13 = vor.u32 %v3552_v4, %v3086_v3  ;;  %v3568_v3 = vld [vmem:[#allocation7 + $0xe0] sm:$0xf0]  ;;  %v3051_v4 = vor.u32 %v3540_v54, %v3048_v55  ;;  %v3214_v54 = vld [vmem:[#allocation7 + $0x148] sm:$0xf] }
 0x1b5   :  { %v3909_v7 = vmax.f32 %v1537_v6, 0.0  ;;  %v3131_v6 = vor.u32 %v3560_v58, %v3128_v61  ;;  %v3196_v58 = vld [vmem:[#allocation7 + $0x134] sm:$0xf0]  ;;  %v3175_v61 = vor.u32 %v3573_v59, %v3174_v45  ;;  %v3155_v12 = vor.u32 %v3568_v3, %v3154_v2  ;;  %v3136_v45 = vld [vmem:[#allocation7 + $0xbc] sm:$0xf0] }
 0x1b6   :  { %2146 = vmatpush.bf16.msra.mxu2 %v3087_v13  ;;  %v3611_v13 = vld [vmem:[#allocation7 + $0x23c] sm:$0xf]  ;;  %v3601_v59 = vld [vmem:[#allocation7 + $0x1ec] sm:$0xf]  ;;  %v3096_v3 = vld [vmem:[#allocation7 + $0x6c] sm:$0xf0] }
 0x1b7   :  { %1541 = vst [vmem:[%s3969_s11] sm:$0xff] %v3909_v7  ;;  %v1543_v8 = vmul.f32 0.5, %v3909_v7  ;;  %2170 = vmatpush.bf16.msrb.mxu0 %v3131_v6  ;;  %v3608_v6 = vld [vmem:[#allocation7 + $0x220] sm:$0xf0]  ;;  %v3299_v50 = vor.u32 %v3601_v59, %v3296_v49  ;;  %v3551_v2 = vld [vmem:[#allocation7 + $0x5c] sm:$0xf] }
 0x1b8   :  { %v3142_v59 = vld [vmem:[#allocation7 + $0xb0] sm:$0xf]  ;;  %v3564_v49 = vld [vmem:[#allocation7 + $0xc0] sm:$0xf0] }
 0x1b9   :  { %v1544_v9 = vmul.f32 1.442695, %v1543_v8  ;;  %v3592_v8 = vld [vmem:[#allocation7 + $0x1a0] sm:$0xf0] }
 0x1ba   :  { %v1538_v10 = vpop.f32.mrf.mxu3  ;;  %v3247_v14 = vor.u32 %v3592_v8, %v3246_v5  ;;  %2147 = vmatpush.bf16.msra.mxu2 %v3067_v23  ;;  %v3314_v5 = vld [vmem:[#allocation7 + $0x210] sm:$0xf]  ;;  %v3274_v23 = vld [vmem:[#allocation7 + $0x1c0] sm:$0xf] }
 0x1bb   :  { %3632 = vpow2.f32 %v1544_v9  ;;  %v3291_v9 = vor.u32 %v3600_v62, %v3288_v0  ;;  %v3555_v10 = vld [vmem:[#allocation7 + $0x7c] sm:$0xf]  ;;  %v3616_v62 = vld [vmem:[#allocation7 + $0x264] sm:$0xf]  ;;  %v3356_v0 = vld [vmem:[#allocation7 + $0x274] sm:$0xf0]  ;;  %v3315_v15 = vor.u32 %v3608_v6, %v3314_v5  ;;  %v3099_v5 = vor.u32 %v3551_v2, %v3096_v3 }
 0x1bc   :  { %2159 = vmatpush.bf16.msra.mxu3 %v3247_v14  ;;  %v3336_v14 = vld [vmem:[#allocation7 + $0x24c] sm:$0xf0]  ;;  %v3594_v2 = vld [vmem:[#allocation7 + $0x1b0] sm:$0xf0] }
 0x1bd   :  { %2183 = vmatpush.bf16.msrb.mxu1 %v3291_v9  ;;  %v3199_v9 = vor.u32 %v3576_v57, %v3196_v58  ;;  %v3339_v18 = vor.u32 %v3611_v13, %v3336_v14  ;;  %v3116_v57 = vld [vmem:[#allocation7 + $0x94] sm:$0xf0]  ;;  %v3256_v6 = vld [vmem:[#allocation7 + $0x1ac] sm:$0xf0]  ;;  %v3541_v14 = vld [vmem:[#allocation7 + $0xc] sm:$0xf] }
 0x1be   :  { %2148 = vmatpush.bf16.msra.mxu2 %v3047_v36  ;;  %v3159_v36 = vor.u32 %v3566_v33, %v3156_v34  ;;  %v3182_v34 = vld [vmem:[#allocation7 + $0x100] sm:$0xf] }
 0x1c0   :  { %2160 = vmatpush.bf16.msra.mxu3 %v3227_v24  ;;  %v3598_v24 = vld [vmem:[#allocation7 + $0x1d0] sm:$0xf0] }
 0x1c1   :  { %v3633_v53 = vpop.eup %3632  ;;  %2184 = vmatpush.bf16.msrb.mxu1 %v3271_v17  ;;  %v3275_v26 = vor.u32 %v3598_v24, %v3274_v23  ;;  %v3202_v24 = vld [vmem:[#allocation7 + $0x128] sm:$0xf] }
 0x1c2   :  { %1547 = vrot.lane.b32.xlu0 %v3633_v53, %s3765_s2  ;;  %v3108_v53 = vld [vmem:[#allocation7 + $0x8c] sm:$0xf0]  ;;  %2193 = vmatpush.bf16.msrb.mxu2 %v3195_v44  ;;  %v3561_v44 = vld [vmem:[#allocation7 + $0xac] sm:$0xf] }
 0x1c3   :  { %v3111_v16 = vor.u32 %v3555_v10, %v3108_v53  ;;  %v3359_v10 = vor.u32 %v3616_v62, %v3356_v0  ;;  %v3571_v53 = vld [vmem:[#allocation7 + $0xfc] sm:$0xf]  ;;  %v3596_v62 = vld [vmem:[#allocation7 + $0x1c4] sm:$0xf]  ;;  %v3276_v0 = vld [vmem:[#allocation7 + $0x1d4] sm:$0xf0] }
 0x1c4   :  { %2161 = vmatpush.bf16.msra.mxu3 %v3207_v43  ;;  %v3179_v17 = vor.u32 %v3571_v53, %v3176_v11  ;;  %v3588_v43 = vld [vmem:[#allocation7 + $0x180] sm:$0xf0]  ;;  %v3586_v53 = vld [vmem:[#allocation7 + $0x174] sm:$0xf] }
 0x1c5   :  { %2171 = vmatpush.bf16.msrb.mxu0 %v3111_v16  ;;  %2185 = vmatpush.bf16.msrb.mxu1 %v3251_v31  ;;  %v3294_v16 = vld [vmem:[#allocation7 + $0x1e8] sm:$0xf] }
 0x1c6   :  { %2194 = vmatpush.bf16.msrb.mxu2 %v3175_v61  ;;  %v3295_v20 = vor.u32 %v3603_v48, %v3294_v16  ;;  %v3216_v16 = vld [vmem:[#allocation7 + $0x15c] sm:$0xf0] }
 0x1c7   :  { %v3219_v48 = vor.u32 %v3581_v63, %v3216_v16 }
 0x1c8   :  { %2206 = vmatpush.bf16.msrb.mxu3 %v3355_v47  ;;  %v3139_v47 = vor.u32 %v3561_v44, %v3136_v45  ;;  %v3322_v44 = vld [vmem:[#allocation7 + $0x218] sm:$0xf]  ;;  %v3609_v45 = vld [vmem:[#allocation7 + $0x228] sm:$0xf0] }
 0x1c9   :  { %2172 = vmatpush.bf16.msrb.mxu0 %v3091_v27  ;;  %2186 = vmatpush.bf16.msrb.mxu1 %v3231_v52  ;;  %v3094_v27 = vld [vmem:[#allocation7 + $0x58] sm:$0xf]  ;;  %v3543_v52 = vld [vmem:[#allocation7 + $0x18] sm:$0xf0] }
 0x1ca   :  { %2195 = vmatpush.bf16.msrb.mxu2 %v3155_v12  ;;  %v3236_v12 = vld [vmem:[#allocation7 + $0x184] sm:$0xf0] }
 0x1cb   :  { %v3239_v13 = vor.u32 %v3586_v53, %v3236_v12  ;;  %v3544_v12 = vld [vmem:[#allocation7 + $0x20] sm:$0xf0] }
 0x1cc   :  { %2207 = vmatpush.bf16.msrb.mxu3 %v3335_v1  ;;  %v3279_v1 = vor.u32 %v3596_v62, %v3276_v0  ;;  %v3102_v62 = vld [vmem:[#allocation7 + $0x60] sm:$0xf]  ;;  %v3554_v0 = vld [vmem:[#allocation7 + $0x70] sm:$0xf0] }
 0x1cd   :  { %2173 = vmatpush.bf16.msrb.mxu0 %v3071_v51  ;;  %v3054_v51 = vld [vmem:[#allocation7 + $0x8] sm:$0xf]  ;;  %v3103_v3 = vor.u32 %v3554_v0, %v3102_v62 }
 0x1ce   :  { %2196 = vmatpush.bf16.msrb.mxu2 %v3135_v19  ;;  %v3055_v55 = vor.u32 %v3543_v52, %v3054_v51  ;;  %v3604_v51 = vld [vmem:[#allocation7 + $0x200] sm:$0xf0]  ;;  %v3143_v52 = vor.u32 %v3564_v49, %v3142_v59 }
 0x1d0   :  { %2208 = vmatpush.bf16.msrb.mxu3 %v3315_v15  ;;  %v3056_v15 = vld [vmem:[#allocation7 + $0x1c] sm:$0xf0] }
 0x1d1   :  { %2174 = vmatpush.bf16.msrb.mxu0 %v3051_v4  ;;  %v3591_v4 = vld [vmem:[#allocation7 + $0x19c] sm:$0xf]  ;;  %v3059_v60 = vor.u32 %v3541_v14, %v3056_v15  ;;  %v3584_v14 = vld [vmem:[#allocation7 + $0x160] sm:$0xf0] }
 0x1d4   :  { %2209 = vmatpush.bf16.msrb.mxu3 %v3295_v20 }
 0x1d8   :  { %2210 = vmatpush.bf16.msrb.mxu3 %v3275_v26  ;;  %v3362_v26 = vld [vmem:[#allocation7 + $0x268] sm:$0xf] }
 0x234   :  { %v1548_v28 = vpop.permute.xlu0 %1547 }
 0x235   :  { %v1550_v32 = vmul.f32 %v1548_v28, %v1542_v22  ;;  %v3558_v22 = vld [vmem:[#allocation7 + $0x90] sm:$0xf0]  ;;  %v3553_v28 = vld [vmem:[#allocation7 + $0x68] sm:$0xf0] }
 0x236   :  { %v3115_v25 = vor.u32 %v3558_v22, %v3114_v21  ;;  %v3095_v31 = vor.u32 %v3553_v28, %v3094_v27  ;;  %v3619_v27 = vld [vmem:[#allocation7 + $0x278] sm:$0xf0] }
 0x237   :  { %v1551_v40 = vadd.f32 %v1550_v32, %v3909_v7  ;;  %v3580_v7 = vld [vmem:[#allocation7 + $0x144] sm:$0xf]  ;;  %v3255_v32 = vor.u32 %v3593_v30, %v3254_v29  ;;  %v3363_v33 = vor.u32 %v3619_v27, %v3362_v26 }
 0x238   :  { %v3211_v8 = vor.u32 %v3580_v7, %v3208_v56  ;;  %2197 = vmatpush.bf16.msrb.mxu2 %v3115_v25  ;;  %v3583_v7 = vld [vmem:[#allocation7 + $0x158] sm:$0xf0]  ;;  %v3556_v56 = vld [vmem:[#allocation7 + $0x84] sm:$0xf] }
 0x239   :  { %v1552_v46 = vpack.c.bf16 %v1551_v40, %v1551_v40  ;;  %2211 = vmatpush.bf16.msrb.mxu3 %v3255_v32  ;;  %v3548_v40 = vld [vmem:[#allocation7 + $0x40] sm:$0xf0]  ;;  %v3215_v58 = vor.u32 %v3583_v7, %v3214_v54  ;;  %v3119_v61 = vor.u32 %v3556_v56, %v3116_v57  ;;  %v3579_v25 = vld [vmem:[#allocation7 + $0x138] sm:$0xf0]  ;;  %v3282_v56 = vld [vmem:[#allocation7 + $0x1c8] sm:$0xf] }
 0x23a   :  { %2187 = vmatpush.bf16.msrb.mxu1 %v3211_v8  ;;  %v3075_v42 = vor.u32 %v3548_v40, %v3074_v39  ;;  %v3259_v8 = vor.u32 %v3591_v4, %v3256_v6  ;;  %v3203_v32 = vor.u32 %v3579_v25, %v3202_v24  ;;  %v3183_v40 = vor.u32 %v3574_v35, %v3182_v34  ;;  %v3559_v7 = vld [vmem:[#allocation7 + $0x98] sm:$0xf0]  ;;  %v3549_v6 = vld [vmem:[#allocation7 + $0x48] sm:$0xf0] }
 0x23b   :  { %3042 = vmatmul.msk.bf16.vlgmr.msra.gmra.mxu0 %vm1583_vm1, %v1552_v46  ;;  %3043 = vmatmul.msk.bf16.vlgmr.msra.gmra.mxu1 %vm1583_vm1, %v1552_v46  ;;  %v3235_v46 = vor.u32 %v3588_v43, %v3234_v41  ;;  %v3569_v43 = vld [vmem:[#allocation7 + $0xe8] sm:$0xf0]  ;;  %v3599_v57 = vld [vmem:[#allocation7 + $0x1d8] sm:$0xf0] }
 0x23c   :  { %2219 = vmatpush.bf16.msra.mxu0 %v3199_v9  ;;  %2198 = vmatpush.bf16.msrb.mxu2 %v3095_v31  ;;  %v3546_v9 = vld [vmem:[#allocation7 + $0x34] sm:$0xf] }
 0x23d   :  { %2212 = vmatpush.bf16.msrb.mxu3 %v3235_v46 }
 0x23e   :  { %2232 = vmatpush.bf16.msra.mxu1 %v3359_v10  ;;  %v3076_v10 = vld [vmem:[#allocation7 + $0x44] sm:$0xf0] }
 0x23f   :  { %v3079_v11 = vor.u32 %v3546_v9, %v3076_v10  ;;  %v3589_v9 = vld [vmem:[#allocation7 + $0x188] sm:$0xf0] }
 0x240   :  { %2220 = vmatpush.bf16.msra.mxu0 %v3179_v17  ;;  %2199 = vmatpush.bf16.msrb.mxu2 %v3075_v42  ;;  %v1557_v17 = vld [vmem:[%s3965_s7] sm:$0x3]  ;;  %v3162_v42 = vld [vmem:[#allocation7 + $0xd8] sm:$0xf] }
 0x241   :  { %2213 = vmatpush.bf16.msrb.mxu3 %v3215_v58  ;;  %v1560_v19 = vperm.slane %v1557_v17, 1  ;;  %v3163_v46 = vor.u32 %v3569_v43, %v3162_v42 }
 0x242   :  { %2233 = vmatpush.bf16.msra.mxu1 %v3339_v18  ;;  %v1559_v18 = vperm.slane %v1557_v17, 0 }
 0x244   :  { %2221 = vmatpush.bf16.msra.mxu0 %v3159_v36  ;;  %2200 = vmatpush.bf16.msrb.mxu2 %v3055_v55  ;;  %v3342_v36 = vld [vmem:[#allocation7 + $0x240] sm:$0xf]  ;;  %v3122_v55 = vld [vmem:[#allocation7 + $0x88] sm:$0xf] }
 0x245   :  { %v3343_v41 = vor.u32 %v3614_v37, %v3342_v36  ;;  %v3123_v58 = vor.u32 %v3559_v7, %v3122_v55 }
 0x246   :  { %2234 = vmatpush.bf16.msra.mxu1 %v3319_v38 }
 0x248   :  { %2222 = vmatpush.bf16.msra.mxu0 %v3139_v47  ;;  %v3323_v47 = vor.u32 %v3609_v45, %v3322_v44 }
 0x24a   :  { %2235 = vmatpush.bf16.msra.mxu1 %v3299_v50  ;;  %v3302_v50 = vld [vmem:[#allocation7 + $0x1f0] sm:$0xf] }
 0x24b   :  { %v3303_v54 = vor.u32 %v3604_v51, %v3302_v50 }
 0x24c   :  { %2223 = vmatpush.bf16.msra.mxu0 %v3119_v61  ;;  %v3283_v61 = vor.u32 %v3599_v57, %v3282_v56 }
 0x24e   :  { %2236 = vmatpush.bf16.msra.mxu1 %v3279_v1  ;;  %v3262_v1 = vld [vmem:[#allocation7 + $0x1a0] sm:$0xf] }
 0x24f   :  { %v3263_v4 = vor.u32 %v3594_v2, %v3262_v1 }
 0x250   :  { %2224 = vmatpush.bf16.msra.mxu0 %v3099_v5  ;;  %v3082_v5 = vld [vmem:[#allocation7 + $0x38] sm:$0xf] }
 0x251   :  { %v3083_v10 = vor.u32 %v3549_v6, %v3082_v5 }
 0x252   :  { %2237 = vmatpush.bf16.msra.mxu1 %v3259_v8  ;;  %v3242_v8 = vld [vmem:[#allocation7 + $0x178] sm:$0xf] }
 0x253   :  { %v3243_v53 = vor.u32 %v3589_v9, %v3242_v8 }
 0x254   :  { %2225 = vmatpush.bf16.msra.mxu0 %v3079_v11  ;;  %v3062_v11 = vld [vmem:[#allocation7 + $0x10] sm:$0xf] }
 0x255   :  { %v3063_v15 = vor.u32 %v3544_v12, %v3062_v11 }
 0x256   :  { %2238 = vmatpush.bf16.msra.mxu1 %v3239_v13  ;;  %v3222_v13 = vld [vmem:[#allocation7 + $0x150] sm:$0xf] }
 0x257   :  { %v3223_v63 = vor.u32 %v3584_v14, %v3222_v13 }
 0x258   :  { %2226 = vmatpush.bf16.msra.mxu0 %v3059_v60  ;;  %v3948_v60 = vld [vmem:[%s3967_s9] sm:$0x1f]  ;;  %s3766_s9 = smov [#allocation8]  }
 0x259   :  { %v1716_v16 = vperm.slane %v3948_v60, 1  ;;  %s2317_s0 = sshll.u32 %s3766_s9, 4  ;;  %s2318_s0 = int_to_ptr.vmem [resolvable:$true] %s2317_s0 }
 0x25a   :  { %2239 = vmatpush.bf16.msra.mxu1 %v3219_v48 }
 0x2b8   :  { %v1596_v20 = vpop.f32.mrf.mxu0  ;;  %v1609_v21 = vpop.f32.mrf.mxu1 }
 0x2b9   :  { %v1597_v22 = vadd.f32 %v1596_v20, %v1559_v18  ;;  %v1610_v23 = vadd.f32 %v1609_v21, %v1560_v19  ;;  %v1715_v19 = vperm.slane %v3948_v60, 0 }
 0x2bb   :  { %v1613_v28 = vmax.f32 %v1597_v22, 0.0  ;;  %v1614_v29 = vmax.f32 %v1610_v23, 0.0 }
 0x2bd   :  { %v3931_v30 = vpack.c.bf16 %v1613_v28, %v1613_v28  ;;  %v3933_v31 = vpack.c.bf16 %v1614_v29, %v1614_v29 }
 0x2bf   :  { %2149 = vmatmul.bf16.vlgmr.msra.gmra.mxu2 %v3931_v30  ;;  %2162 = vmatmul.bf16.vlgmr.msra.gmra.mxu3 %v3933_v31 }
 0x2c0   :  { %2175 = vmatmul.bf16.vlgmr.msrb.gmra.mxu0 %v3931_v30  ;;  %2188 = vmatmul.bf16.vlgmr.msrb.gmra.mxu1 %v3933_v31  ;;  %v1598_v38 = vpop.f32.mrf.mxu0  ;;  %v1611_v39 = vpop.f32.mrf.mxu1 }
 0x2c1   :  { %2245 = vmatpush.bf16.msra.mxu2 %v3203_v32  ;;  %2258 = vmatpush.bf16.msra.mxu3 %v3363_v33  ;;  %v1718_v33 = vperm.slane %v3948_v60, 3  ;;  %v1717_v39 = vperm.slane %v3948_v60, 2 }
 0x2c5   :  { %2246 = vmatpush.bf16.msra.mxu2 %v3183_v40  ;;  %2259 = vmatpush.bf16.msra.mxu3 %v3343_v41 }
 0x2c9   :  { %2247 = vmatpush.bf16.msra.mxu2 %v3163_v46  ;;  %2260 = vmatpush.bf16.msra.mxu3 %v3323_v47 }
 0x2cd   :  { %2248 = vmatpush.bf16.msra.mxu2 %v3143_v52  ;;  %2261 = vmatpush.bf16.msra.mxu3 %v3303_v54 }
 0x2cf   :  { %2201 = vmatmul.bf16.vlgmr.msrb.gmra.mxu2 %v3931_v30  ;;  %2214 = vmatmul.bf16.vlgmr.msrb.gmra.mxu3 %v3933_v31 }
 0x2d0   :  { %2227 = vmatmul.bf16.vlgmr.msra.gmra.mxu0 %v3931_v30  ;;  %2240 = vmatmul.bf16.vlgmr.msra.gmra.mxu1 %v3933_v31 }
 0x2d1   :  { %2249 = vmatpush.bf16.msra.mxu2 %v3123_v58  ;;  %2262 = vmatpush.bf16.msra.mxu3 %v3283_v61 }
 0x2d5   :  { %2250 = vmatpush.bf16.msra.mxu2 %v3103_v3  ;;  %2263 = vmatpush.bf16.msra.mxu3 %v3263_v4  ;;  %v1719_v3 = vperm.slane %v3948_v60, 4 }
 0x2d9   :  { %2251 = vmatpush.bf16.msra.mxu2 %v3083_v10  ;;  %2264 = vmatpush.bf16.msra.mxu3 %v3243_v53 }
 0x2dd   :  { %2252 = vmatpush.bf16.msra.mxu2 %v3063_v15  ;;  %2265 = vmatpush.bf16.msra.mxu3 %v3223_v63 }
 0x2e0   :  { %2253 = vmatmul.bf16.vlgmr.msra.gmra.mxu2 %v3931_v30  ;;  %2266 = vmatmul.bf16.vlgmr.msra.gmra.mxu3 %v3933_v31 }
 0x33d   :  { %v2176_v48 = vpop.f32.mrf.mxu0  ;;  %v2189_v17 = vpop.f32.mrf.mxu1 }
 0x33e   :  { %v2177_v18 = vadd.f32 %v2176_v48, %v1716_v16 }
 0x340   :  { %v2190_v20 = vadd.f32 %v2189_v17, %v2177_v18 }
 0x342   :  { %v2272_v21 = vsub.f32 0.0, %v2190_v20  ;;  %v2150_v22 = vpop.f32.mrf.mxu2  ;;  %v2163_v23 = vpop.f32.mrf.mxu3 }
 0x343   :  { %v2151_v24 = vadd.f32 %v2150_v22, %v1715_v19 }
 0x344   :  { %v2278_v25 = vmul.f32 1.442695, %v2272_v21 }
 0x345   :  { %v2164_v26 = vadd.f32 %v2163_v23, %v2151_v24  ;;  %v2178_v27 = vpop.f32.mrf.mxu0  ;;  %v2191_v28 = vpop.f32.mrf.mxu1 }
 0x346   :  { %3634 = vpow2.f32 %v2278_v25 }
 0x347   :  { %v2271_v29 = vsub.f32 0.0, %v2164_v26 }
 0x349   :  { %v2276_v30 = vmul.f32 1.442695, %v2271_v29 }
 0x34a   :  { %v2152_v31 = vpop.f32.mrf.mxu2  ;;  %v2165_v32 = vpop.f32.mrf.mxu3 }
 0x34b   :  { %3636 = vpow2.f32 %v2276_v30 }
 0x34c   :  { %v3635_v34 = vpop.eup %3634 }
 0x34d   :  { %v2287_v35 = vadd.f32 1.0, %v3635_v34  ;;  %v2228_v36 = vpop.f32.mrf.mxu0  ;;  %v2241_v37 = vpop.f32.mrf.mxu1 }
 0x34e   :  { %v2229_v38 = vadd.f32 %v2228_v36, %v1718_v33 }
 0x34f   :  { %3638 = vrcp.f32 %v2287_v35 }
 0x350   :  { %v2242_v40 = vadd.f32 %v2241_v37, %v2229_v38 }
 0x351   :  { %v3637_v41 = vpop.eup %3636 }
 0x352   :  { %v2286_v42 = vadd.f32 1.0, %v3637_v41  ;;  %v2274_v43 = vsub.f32 0.0, %v2242_v40  ;;  %v2202_v44 = vpop.f32.mrf.mxu2  ;;  %v2215_v45 = vpop.f32.mrf.mxu3 }
 0x353   :  { %v2203_v46 = vadd.f32 %v2202_v44, %v1717_v39 }
 0x354   :  { %3640 = vrcp.f32 %v2286_v42  ;;  %v2282_v47 = vmul.f32 1.442695, %v2274_v43 }
 0x355   :  { %v2216_v59 = vadd.f32 %v2215_v45, %v2203_v46  ;;  %v2230_v49 = vpop.f32.mrf.mxu0  ;;  %v2243_v50 = vpop.f32.mrf.mxu1 }
 0x356   :  { %v3639_v51 = vpop.eup %3638  ;;  %3642 = vpow2.f32 %v2282_v47 }
 0x357   :  { %v2273_v52 = vsub.f32 0.0, %v2216_v59  ;;  %v2297_v54 = vmax.f32 %v3639_v51, 0.0 }
 0x359   :  { %v2280_v55 = vmul.f32 1.442695, %v2273_v52  ;;  %v2302_v62 = vmin.f32 %v2297_v54, 1.0 }
 0x35a   :  { %v3641_v7 = vpop.eup %3640  ;;  %v2204_v56 = vpop.f32.mrf.mxu2 }
 0x35b   :  { %v2217_v57 = vpop.f32.mrf.mxu3  ;;  %v2296_v58 = vmax.f32 %v3641_v7, 0.0  ;;  %3644 = vpow2.f32 %v2280_v55 }
 0x35c   :  { %v3643_v61 = vpop.eup %3642 }
 0x35d   :  { %v2301_v0 = vmin.f32 %v2296_v58, 1.0  ;;  %v2289_v1 = vadd.f32 1.0, %v3643_v61 }
 0x35f   :  { %v2306_v2 = vpack.c.bf16 %v2302_v62, %v2301_v0  ;;  %3646 = vrcp.f32 %v2289_v1 }
 0x361   :  { %v3645_v4 = vpop.eup %3644  ;;  %2309 = vst [vmem:[#allocation8] sm:$0xff] %v2306_v2 }
 0x362   :  { %v2288_v5 = vadd.f32 1.0, %v3645_v4 }
 0x363   :  { %v2254_v6 = vpop.f32.mrf.mxu2  ;;  %v2267_v8 = vpop.f32.mrf.mxu3 }
 0x364   :  { %3648 = vrcp.f32 %v2288_v5  ;;  %v2255_v9 = vadd.f32 %v2254_v6, %v1719_v3 }
 0x365   :  { %v3647_v10 = vpop.eup %3646 }
 0x366   :  { %v2268_v53 = vadd.f32 %v2267_v8, %v2255_v9  ;;  %v2299_v12 = vmax.f32 %v3647_v10, 0.0 }
 0x368   :  { %v2275_v11 = vsub.f32 0.0, %v2268_v53  ;;  %v2304_v48 = vmin.f32 %v2299_v12, 1.0 }
 0x36a   :  { %v3649_v13 = vpop.eup %3648  ;;  %v2284_v14 = vmul.f32 1.442695, %v2275_v11 }
 0x36b   :  { %v2298_v15 = vmax.f32 %v3649_v13, 0.0  ;;  %v2256_v63 = vpop.f32.mrf.mxu2  ;;  %v2269_v16 = vpop.f32.mrf.mxu3 }
 0x36c   :  { %3650 = vpow2.f32 %v2284_v14 }
 0x36d   :  { %v2303_v17 = vmin.f32 %v2298_v15, 1.0 }
 0x36f   :  { %v2307_v60 = vpack.c.bf16 %v2304_v48, %v2303_v17 }
 0x371   :  { %2310 = vst [vmem:[#allocation8 + $0x8] sm:$0xff] %v2307_v60 }
 0x372   :  { %v3651_v18 = vpop.eup %3650 }
 0x373   :  { %v2290_v19 = vadd.f32 1.0, %v3651_v18 }
 0x375   :  { %3652 = vrcp.f32 %v2290_v19 }
 0x37b   :  { %v3653_v20 = vpop.eup %3652 }
 0x37c   :  { %v2300_v21 = vmax.f32 %v3653_v20, 0.0 }
 0x37e   :  { %v2305_v22 = vmin.f32 %v2300_v21, 1.0 }
 0x380   :  { %v2308_v23 = vpack.c.bf16 %v2305_v22, %v2305_v22 }
 0x382   :  { %2311 = vst [vmem:[#allocation8 + $0x10] sm:$0xf] %v2308_v23 }
 0x383   :  { %2322 = dma.vmem_to_hbm [thread:$0]  %s2318_s0, 320, %s2320_s23, [#allocation4]  }
 0x384   :  { %3754 = dma.done.wait [#allocation4], 320  }
 0x385   :  { %3755 = vsyncadd [#allocation4], 4294966976 }
 0x386   :  { %2331 = vsyncpa [#allocation3], 1 }
 0x387   :  { %2332 = vsyncpa [#allocation6], 1 }
 0x388   :  { %2333 = vsyncpa [#allocation4], 1 }

</bundles_post_ra>
